<compile_context>
chip_gen: v5e
topology: v5e:2x2
jax: 0.10.0
libtpu: 0.0.40
codegen_flags: <defaults>
</compile_context>

<pallas_src>
import jax
import jax.numpy as jnp
from jax.experimental import pallas as pl
from jax.experimental.pallas import tpu as pltpu


def _classifier_kernel(x_ref, w_ref, b_ref, o_ref):
    # x_ref: (TB, C, S)   TB samples; channels on sublanes, spatial on lanes
    # w_ref: (C, K_pad)   weight transposed and pre-scaled by 1/S (zero-padded lanes)
    # b_ref: (1, K_pad)   zero-padded bias
    # o_ref: (TB, K_pad)  lane-dense output tile
    x = x_ref[...].astype(jnp.float32)                       # (TB, C, S)
    pooled = jnp.sum(x, axis=2)                              # (TB, C): global-pool numerator
    # TODO(synk): Dropout(p=0.2) is identity in eval mode; training-mode dropout
    # (pltpu.prng_random_bits mask) is intentionally omitted.
    logits = jnp.dot(pooled, w_ref[...],
                     preferred_element_type=jnp.float32) + b_ref[...]
    o_ref[...] = logits.astype(o_ref.dtype)                  # full (TB, K_pad) store


def _pick_batch_tile(n):
    """Samples per grid step: 32 by default, rounded-up multiple of 8 for tiny N."""
    tb = 32
    if n < tb:
        tb = max(8, ((n + 7) // 8) * 8)
    return tb


def intermediate_classifier(x_nchw, weight, bias, residual_block_type=2):
    """x_nchw: (N, C, H, W); weight: (num_classes, C); bias: (num_classes,)."""
    N, C, H, W = x_nchw.shape
    num_classes = weight.shape[0]

    # AvgPool2d(kernel_size) is only a *global* pool when H == W == kernel_size.
    if residual_block_type == 2:
        total = 3584
    elif residual_block_type == 3:
        total = 14336
    else:
        raise NotImplementedError
    assert total % C == 0, f"{total} must be divisible by num_channels={C}"
    kernel_size = total // C
    # TODO(synk): general sliding-window AvgPool (H != kernel_size) is not implemented.
    assert H == kernel_size and W == kernel_size, "kernel assumes global average pool"

    S = H * W
    K_pad = ((num_classes + 127) // 128) * 128               # lane-dense output width

    # Batched tiling over the sample dimension.
    TB = _pick_batch_tile(N)
    num_tiles = -(-N // TB)                                   # ceil div
    N_pad = num_tiles * TB

    # Native layout: (N, C, H, W) -> (N, C, S) is a pure reshape (no transpose).
    x_ncs = x_nchw.reshape(N, C, S)
    if N_pad != N:
        x_ncs = jnp.concatenate(
            [x_ncs, jnp.zeros((N_pad - N, C, S), x_ncs.dtype)], axis=0)

    # Fold the 1/S mean into the tiny weight; pad classes to K_pad lanes.
    w_scaled = jnp.transpose(weight, (1, 0)).astype(jnp.float32) * (1.0 / S)  # (C, K)
    w_pad = jnp.zeros((C, K_pad), jnp.float32).at[:, :num_classes].set(w_scaled)
    b_pad = jnp.zeros((1, K_pad), jnp.float32).at[:, :num_classes].set(
        bias.astype(jnp.float32).reshape(1, num_classes))

    # Scoped-VMEM: 2x double-buffered input tile + constants + headroom,
    # clamped to stay well under v7x's 64 MiB physical VMEM.
    tile_bytes = TB * C * S * x_ncs.dtype.itemsize
    vmem_limit = min(48 * 1024 * 1024,
                     max(32 * 1024 * 1024, 2 * tile_bytes + 4 * 1024 * 1024))

    cost = pl.CostEstimate(
        flops=N_pad * C * S + 2 * N_pad * C * K_pad,
        transcendentals=0,
        bytes_accessed=(x_ncs.dtype.itemsize * N_pad * C * S
                        + 4 * (C * K_pad + K_pad + N_pad * K_pad)),
    )

    out = pl.pallas_call(
        _classifier_kernel,
        out_shape=jax.ShapeDtypeStruct((N_pad, K_pad), jnp.float32),
        grid_spec=pltpu.PrefetchScalarGridSpec(
            num_scalar_prefetch=0,
            grid=(num_tiles,),
            in_specs=[
                pl.BlockSpec((TB, C, S), lambda i: (i, 0, 0)),
                pl.BlockSpec((C, K_pad), lambda i: (0, 0)),   # resident across grid
                pl.BlockSpec((1, K_pad), lambda i: (0, 0)),   # resident across grid
            ],
            out_specs=pl.BlockSpec((TB, K_pad), lambda i: (i, 0)),
        ),
        compiler_params=pltpu.CompilerParams(
            dimension_semantics=("parallel",),
            vmem_limit_bytes=vmem_limit),
        cost_estimate=cost,
    )(x_ncs, w_pad, b_pad)

    return out[:N, :num_classes]


def reference(x_nchw, weight, bias):
    pooled = jnp.mean(x_nchw.astype(jnp.float32), axis=(2, 3))   # (N, C)
    return pooled @ weight.T + bias


if __name__ == "__main__":
    # residual_block_type == 2: kernel_size = 3584 / num_channels.
    # num_channels = 224 -> kernel_size = 16 (global pool over a 16x16 map).
    batch, num_channels, spatial, num_classes = 2, 224, 16, 10

    key = jax.random.PRNGKey(0)
    kx, kw, kb = jax.random.split(key, 3)
    x = jax.random.normal(kx, (batch, num_channels, spatial, spatial), jnp.float32)

    # Deterministic Linear init (PyTorch-style uniform(-1/sqrt(C), 1/sqrt(C))).
    bound = 1.0 / (num_channels ** 0.5)
    weight = jax.random.uniform(kw, (num_classes, num_channels), jnp.float32,
                                minval=-bound, maxval=bound)
    bias = jax.random.uniform(kb, (num_classes,), jnp.float32,
                              minval=-bound, maxval=bound)

    out = intermediate_classifier(x, weight, bias, residual_block_type=2)
    out = jax.block_until_ready(out)

    ref = reference(x, weight, bias)
    assert out.shape == (batch, num_classes)
    assert jnp.allclose(out, ref, atol=1e-4, rtol=1e-4), "mismatch vs reference"
    print("KERNEL_OK")
</pallas_src>

<mosaic_0001>
module attributes {stable_mosaic.version = 11 : i64} {
  func.func @_classifier_kernel(%arg0: i32, %arg1: memref<8x224x256xf32, #tpu.memory_space<vmem>>, %arg2: memref<224x128xf32, #tpu.memory_space<vmem>>, %arg3: memref<1x128xf32, #tpu.memory_space<vmem>>, %arg4: memref<8x128xf32, #tpu.memory_space<vmem>>) attributes {dimension_semantics = [#tpu.dimension_semantics<parallel>], iteration_bounds = array<i64: 1>, scalar_prefetch = 0 : i64, scratch_operands = 0 : i64, tpu.core_type = #tpu.core_type<tc>, window_params = [{transform_indices = @transform_0, window_bounds = array<i64: 8, 224, 256>}, {pipeline_mode = #tpu.pipeline_mode<synchronous>, transform_indices = @transform_1, window_bounds = array<i64: 224, 128>}, {pipeline_mode = #tpu.pipeline_mode<synchronous>, transform_indices = @transform_2, window_bounds = array<i64: 1, 128>}, {transform_indices = @transform_3, window_bounds = array<i64: 8, 128>}]} {
    %c0 = arith.constant 0 : index
    %c0_0 = arith.constant 0 : index
    %c0_1 = arith.constant 0 : index
    %0 = vector.load %arg1[%c0, %c0_0, %c0_1] : memref<8x224x256xf32, #tpu.memory_space<vmem>>, vector<8x224x256xf32>
    %cst = arith.constant dense<0.000000e+00> : vector<8x224xf32>
    %1 = vector.multi_reduction <add>, %0, %cst [2] : vector<8x224x256xf32> to vector<8x224xf32>
    %c0_2 = arith.constant 0 : index
    %c0_3 = arith.constant 0 : index
    %2 = vector.load %arg2[%c0_2, %c0_3] : memref<224x128xf32, #tpu.memory_space<vmem>>, vector<224x128xf32>
    %cst_4 = arith.constant dense<0.000000e+00> : vector<8x128xf32>
    %3 = tpu.matmul %1, %2, %cst_4 {dimension_numbers = #tpu.dot_dimension_numbers<[1], [0], [0], [1], [0, 0, 1, 1], [], []>} : vector<8x224xf32>, vector<224x128xf32>, vector<8x128xf32> -> vector<8x128xf32>
    %c0_5 = arith.constant 0 : index
    %c0_6 = arith.constant 0 : index
    %4 = vector.load %arg3[%c0_5, %c0_6] : memref<1x128xf32, #tpu.memory_space<vmem>>, vector<1x128xf32>
    %5 = vector.broadcast %4 : vector<1x128xf32> to vector<8x128xf32>
    %6 = arith.addf %3, %5 : vector<8x128xf32>
    %c0_7 = arith.constant 0 : index
    %c0_8 = arith.constant 0 : index
    %7 = vector.load %arg4[%c0_7, %c0_8] : memref<8x128xf32, #tpu.memory_space<vmem>>, vector<8x128xf32>
    tpu.vector_store %arg4[%c0_7, %c0_8], %6 {strides = array<i32>} : memref<8x128xf32, #tpu.memory_space<vmem>>, vector<8x128xf32>,
    return
  }
  func.func @transform_0(%arg0: i32) -> (i32, i32, i32) {
    %c0_i32 = arith.constant 0 : i32
    %c0_i32_0 = arith.constant 0 : i32
    %c0_i32_1 = arith.constant 0 : i32
    return %arg0, %c0_i32, %c0_i32_0 : i32, i32, i32
  }
  func.func @transform_1(%arg0: i32) -> (i32, i32) {
    %c0_i32 = arith.constant 0 : i32
    %c0_i32_0 = arith.constant 0 : i32
    %c0_i32_1 = arith.constant 0 : i32
    return %c0_i32, %c0_i32_0 : i32, i32
  }
  func.func @transform_2(%arg0: i32) -> (i32, i32) {
    %c0_i32 = arith.constant 0 : i32
    %c0_i32_0 = arith.constant 0 : i32
    %c0_i32_1 = arith.constant 0 : i32
    return %c0_i32, %c0_i32_0 : i32, i32
  }
  func.func @transform_3(%arg0: i32) -> (i32, i32) {
    %c0_i32 = arith.constant 0 : i32
    %c0_i32_0 = arith.constant 0 : i32
    return %arg0, %c0_i32 : i32, i32
  }
}

</mosaic_0001>

<bundles_post_ra>
// kernel: tpu_custom_call.1
= control target key start
LH: loop header
LB: loop body
LE: loop exit
PB: predicated region body
PF: predicated region fallthrough
CT: control target
= control target key end

     0   :  { %8 = vsyncpa [#allocation3], 0  ;;  %s2920_s0 = inlined_call_operand.hbm [shape: f32[8,224,256], index: 0, kind: input, shape index: {}]   ;;  %s2921_s1 = inlined_call_operand.hbm [shape: f32[224,128], index: 1, kind: input, shape index: {}]   ;;  %s2922_s2 = inlined_call_operand.hbm [shape: f32[1,128], index: 2, kind: input, shape index: {}]   ;;  %s2923_s3 = inlined_call_operand.hbm [shape: f32[8,128], index: 3, kind: output, shape index: {}]  }
   0x1   :  { %9 = vsyncpa [#allocation6], 0  ;;  %s28_s14 = sshll.u32 %s2921_s1, 4  ;;  %s29_s14 = int_to_ptr.hbm [resolvable:$true] %s28_s14 }
   0x2   :  { %10 = vsyncpa [#allocation4], 0  ;;  %s2096_s15 = smov [#allocation5]   ;;  %s15_s19 = sshll.u32 %s2920_s0, 4  ;;  %s16_s19 = int_to_ptr.hbm [resolvable:$true] %s15_s19 }
   0x3   :  { %s30_s16 = sshll.u32 %s2096_s15, 4  ;;  %s2097_s20 = smov 128   ;;  %s31_s16 = int_to_ptr.vmem [resolvable:$true] %s30_s16 }
   0x4   :  { %s2098_s21 = smov 8   ;;  %s2099_s22 = smov [#allocation2]  }
   0x5   :  { %36 = dma.hbm_to_vmem [thread:$0]  %s29_s14, 3584, %s31_s16, [#allocation6], %s2097_s20, %s2097_s20, %s2098_s21  }
   0x6   :  { %s17_s23 = sshll.u32 %s2099_s22, 4  ;;  %s2100_s24 = smov 256   ;;  %s18_s23 = int_to_ptr.vmem [resolvable:$true] %s17_s23 }
   0x7   :  { %s2101_s25 = smov 16   ;;  %s42_s27 = sshll.u32 %s2922_s2, 4  ;;  %s43_s27 = int_to_ptr.hbm [resolvable:$true] %s42_s27 }
   0x8   :  { %23 = dma.hbm_to_vmem [thread:$0]  %s16_s19, 57344, %s18_s23, [#allocation3], %s2100_s24, %s2100_s24, %s2101_s25  }
   0x9   :  { %s2102_s28 = smov [#allocation7]  }
   0xa   :  { %s44_s29 = sshll.u32 %s2102_s28, 4  ;;  %s45_s29 = int_to_ptr.vmem [resolvable:$true] %s44_s29 }
   0xb   :  { %47 = dma.hbm_to_vmem [thread:$0]  %s43_s27, 16, %s45_s29, [#allocation6]  }
   0xc   :  { %2090 = dma.done.wait [#allocation3], 57344  }
   0xd   :  { %2091 = vsyncadd [#allocation3], 4294909952 }
   0xe   :  { %2092 = dma.done.wait [#allocation6], 3600  }
   0xf   :  { %2093 = vsyncadd [#allocation6], 4294963696  ;;  %v68_v0 = vld [vmem:[#allocation2 + $0x40] sm:$0xff]  ;;  %v69_v1 = vld [vmem:[#allocation2 + $0x48] sm:$0xff]  ;;  %vm1441_vm0 = vcmask 130112   ;;  %vm1445_vm1 = vcmask 195712  }
  0x10   :  { %v64_v2 = vld [vmem:[#allocation2 + $0x20] sm:$0xff]  ;;  %v520_v3 = vadd.f32 %v69_v1, %v68_v0  ;;  %v65_v4 = vld [vmem:[#allocation2 + $0x28] sm:$0xff]  ;;  %v70_v9 = vld [vmem:[#allocation2 + $0x50] sm:$0xff]  ;;  %vm1449_vm2 = vcmask 261312   ;;  %vm1453_vm3 = vcmask 326912   ;;  %vm1457_vm4 = vcmask 392512  }
  0x11   :  { %v60_v5 = vld [vmem:[#allocation2] sm:$0xff]  ;;  %v61_v6 = vld [vmem:[#allocation2 + $0x8] sm:$0xff]  ;;  %v514_v7 = vadd.f32 %v65_v4, %v64_v2  ;;  %v71_v10 = vld [vmem:[#allocation2 + $0x58] sm:$0xff]  ;;  %vm1461_vm5 = vcmask 458112   ;;  %vm1465_vm6 = vcmask 523712   ;;  %vm2929_vm7 = vcmask 589312  }
  0x12   :  { %v508_v8 = vadd.f32 %v61_v6, %v60_v5  ;;  %521 = vadd.xlane.f32.xlu2 %v520_v3  ;;  %v66_v11 = vld [vmem:[#allocation2 + $0x30] sm:$0xff]  ;;  %v67_v12 = vld [vmem:[#allocation2 + $0x38] sm:$0xff]  ;;  %v523_v15 = vadd.f32 %v71_v10, %v70_v9  ;;  %v76_v18 = vld [vmem:[#allocation2 + $0x80] sm:$0xff]  ;;  %vm2927_vm8 = vcmask 654912   ;;  %vm2926_vm9 = vcmask 720512   ;;  %s2103_s0 = smov [#allocation8]  }
  0x13   :  { %515 = vadd.xlane.f32.xlu1 %v514_v7  ;;  %v62_v13 = vld [vmem:[#allocation2 + $0x10] sm:$0xff]  ;;  %v63_v14 = vld [vmem:[#allocation2 + $0x18] sm:$0xff]  ;;  %v517_v16 = vadd.f32 %v67_v12, %v66_v11  ;;  %v77_v19 = vld [vmem:[#allocation2 + $0x88] sm:$0xff]  ;;  %vm2928_vm10 = vcmask 786112   ;;  %vm2930_vm11 = vcmask 851712   ;;  %vm1489_vm12 = vcmask 917312  }
  0x14   :  { %509 = vadd.xlane.f32.xlu0 %v508_v8  ;;  %v511_v17 = vadd.f32 %v63_v14, %v62_v13  ;;  %v74_v20 = vld [vmem:[#allocation2 + $0x70] sm:$0xff]  ;;  %v75_v21 = vld [vmem:[#allocation2 + $0x78] sm:$0xff]  ;;  %v72_v22 = vld [vmem:[#allocation2 + $0x60] sm:$0xff]  ;;  %v532_v24 = vadd.f32 %v77_v19, %v76_v18  ;;  %vm2925_vm13 = vcmask 982912   ;;  %vm2924_vm14 = vcmask 1048512   ;;  %s1971_s2 = sshll.u32 %s2103_s0, 4  ;;  %s1972_s2 = int_to_ptr.vmem [resolvable:$true] %s1971_s2 }
  0x15   :  { %v73_v23 = vld [vmem:[#allocation2 + $0x68] sm:$0xff]  ;;  %v529_v25 = vadd.f32 %v75_v21, %v74_v20  ;;  %v82_v27 = vld [vmem:[#allocation2 + $0xb0] sm:$0xff]  ;;  %v83_v28 = vld [vmem:[#allocation2 + $0xb8] sm:$0xff]  ;;  %vm1900_vm15 = vcmask 1041409   ;;  %s1973_s5 = sshll.u32 %s2923_s3, 4  ;;  %s1974_s5 = int_to_ptr.hbm [resolvable:$true] %s1973_s5 }
  0x16   :  { %v526_v26 = vadd.f32 %v73_v23, %v72_v22  ;;  %v80_v29 = vld [vmem:[#allocation2 + $0xa0] sm:$0xff]  ;;  %v81_v30 = vld [vmem:[#allocation2 + $0xa8] sm:$0xff]  ;;  %v78_v31 = vld [vmem:[#allocation2 + $0x90] sm:$0xff]  ;;  %v541_v33 = vadd.f32 %v83_v28, %v82_v27 }
  0x17   :  { %v79_v32 = vld [vmem:[#allocation2 + $0x98] sm:$0xff]  ;;  %v538_v34 = vadd.f32 %v81_v30, %v80_v29  ;;  %v88_v36 = vld [vmem:[#allocation2 + $0xe0] sm:$0xff]  ;;  %v89_v37 = vld [vmem:[#allocation2 + $0xe8] sm:$0xff] }
  0x18   :  { %v535_v35 = vadd.f32 %v79_v32, %v78_v31  ;;  %v86_v38 = vld [vmem:[#allocation2 + $0xd0] sm:$0xff]  ;;  %v87_v39 = vld [vmem:[#allocation2 + $0xd8] sm:$0xff]  ;;  %v84_v40 = vld [vmem:[#allocation2 + $0xc0] sm:$0xff]  ;;  %v550_v42 = vadd.f32 %v89_v37, %v88_v36 }
  0x19   :  { %v85_v41 = vld [vmem:[#allocation2 + $0xc8] sm:$0xff]  ;;  %v547_v43 = vadd.f32 %v87_v39, %v86_v38  ;;  %v94_v45 = vld [vmem:[#allocation2 + $0x110] sm:$0xff]  ;;  %v95_v46 = vld [vmem:[#allocation2 + $0x118] sm:$0xff] }
  0x1a   :  { %524 = vadd.xlane.f32.xlu2 %v523_v15  ;;  %v544_v44 = vadd.f32 %v85_v41, %v84_v40  ;;  %v92_v47 = vld [vmem:[#allocation2 + $0x100] sm:$0xff]  ;;  %v93_v48 = vld [vmem:[#allocation2 + $0x108] sm:$0xff]  ;;  %v90_v49 = vld [vmem:[#allocation2 + $0xf0] sm:$0xff]  ;;  %v559_v51 = vadd.f32 %v95_v46, %v94_v45 }
  0x1b   :  { %518 = vadd.xlane.f32.xlu1 %v517_v16  ;;  %v91_v50 = vld [vmem:[#allocation2 + $0xf8] sm:$0xff]  ;;  %v556_v52 = vadd.f32 %v93_v48, %v92_v47  ;;  %v100_v54 = vld [vmem:[#allocation2 + $0x140] sm:$0xff]  ;;  %v101_v55 = vld [vmem:[#allocation2 + $0x148] sm:$0xff] }
  0x1c   :  { %512 = vadd.xlane.f32.xlu0 %v511_v17  ;;  %v553_v53 = vadd.f32 %v91_v50, %v90_v49  ;;  %v98_v56 = vld [vmem:[#allocation2 + $0x130] sm:$0xff]  ;;  %v99_v57 = vld [vmem:[#allocation2 + $0x138] sm:$0xff]  ;;  %v96_v58 = vld [vmem:[#allocation2 + $0x120] sm:$0xff]  ;;  %v568_v60 = vadd.f32 %v101_v55, %v100_v54 }
  0x1d   :  { %v97_v59 = vld [vmem:[#allocation2 + $0x128] sm:$0xff]  ;;  %v565_v61 = vadd.f32 %v99_v57, %v98_v56  ;;  %v106_v63 = vld [vmem:[#allocation2 + $0x170] sm:$0xff]  ;;  %v107_v0 = vld [vmem:[#allocation2 + $0x178] sm:$0xff] }
  0x1e   :  { %v562_v62 = vadd.f32 %v97_v59, %v96_v58  ;;  %v104_v1 = vld [vmem:[#allocation2 + $0x160] sm:$0xff]  ;;  %v105_v2 = vld [vmem:[#allocation2 + $0x168] sm:$0xff]  ;;  %v102_v3 = vld [vmem:[#allocation2 + $0x150] sm:$0xff]  ;;  %v577_v5 = vadd.f32 %v107_v0, %v106_v63 }
  0x1f   :  { %v103_v4 = vld [vmem:[#allocation2 + $0x158] sm:$0xff]  ;;  %v574_v6 = vadd.f32 %v105_v2, %v104_v1  ;;  %v112_v8 = vld [vmem:[#allocation2 + $0x1a0] sm:$0xff]  ;;  %v113_v9 = vld [vmem:[#allocation2 + $0x1a8] sm:$0xff] }
  0x20   :  { %v571_v7 = vadd.f32 %v103_v4, %v102_v3  ;;  %v110_v10 = vld [vmem:[#allocation2 + $0x190] sm:$0xff]  ;;  %v111_v11 = vld [vmem:[#allocation2 + $0x198] sm:$0xff]  ;;  %v108_v12 = vld [vmem:[#allocation2 + $0x180] sm:$0xff]  ;;  %v586_v14 = vadd.f32 %v113_v9, %v112_v8 }
  0x21   :  { %v109_v13 = vld [vmem:[#allocation2 + $0x188] sm:$0xff]  ;;  %v583_v15 = vadd.f32 %v111_v11, %v110_v10  ;;  %v118_v17 = vld [vmem:[#allocation2 + $0x1d0] sm:$0xff]  ;;  %v119_v18 = vld [vmem:[#allocation2 + $0x1d8] sm:$0xff] }
  0x22   :  { %533 = vadd.xlane.f32.xlu2 %v532_v24  ;;  %v580_v16 = vadd.f32 %v109_v13, %v108_v12  ;;  %v116_v19 = vld [vmem:[#allocation2 + $0x1c0] sm:$0xff]  ;;  %v117_v20 = vld [vmem:[#allocation2 + $0x1c8] sm:$0xff]  ;;  %v114_v21 = vld [vmem:[#allocation2 + $0x1b0] sm:$0xff]  ;;  %v595_v23 = vadd.f32 %v119_v18, %v118_v17 }
  0x23   :  { %530 = vadd.xlane.f32.xlu1 %v529_v25  ;;  %v115_v22 = vld [vmem:[#allocation2 + $0x1b8] sm:$0xff]  ;;  %v592_v24 = vadd.f32 %v117_v20, %v116_v19  ;;  %v125_v27 = vld [vmem:[#allocation2 + $0x208] sm:$0xff]  ;;  %v122_v28 = vld [vmem:[#allocation2 + $0x1f0] sm:$0xff] }
  0x24   :  { %527 = vadd.xlane.f32.xlu0 %v526_v26  ;;  %v589_v25 = vadd.f32 %v115_v22, %v114_v21  ;;  %v124_v26 = vld [vmem:[#allocation2 + $0x200] sm:$0xff]  ;;  %v123_v29 = vld [vmem:[#allocation2 + $0x1f8] sm:$0xff]  ;;  %v121_v31 = vld [vmem:[#allocation2 + $0x1e8] sm:$0xff] }
  0x25   :  { %v120_v30 = vld [vmem:[#allocation2 + $0x1e0] sm:$0xff]  ;;  %v604_v32 = vadd.f32 %v125_v27, %v124_v26  ;;  %v131_v36 = vld [vmem:[#allocation2 + $0x238] sm:$0xff]  ;;  %v129_v38 = vld [vmem:[#allocation2 + $0x228] sm:$0xff] }
  0x26   :  { %v128_v37 = vld [vmem:[#allocation2 + $0x220] sm:$0xff]  ;;  %v126_v39 = vld [vmem:[#allocation2 + $0x210] sm:$0xff]  ;;  %v127_v40 = vld [vmem:[#allocation2 + $0x218] sm:$0xff] }
  0x27   :  { %v137_v45 = vld [vmem:[#allocation2 + $0x268] sm:$0xff]  ;;  %v134_v46 = vld [vmem:[#allocation2 + $0x250] sm:$0xff]  ;;  %v135_v47 = vld [vmem:[#allocation2 + $0x258] sm:$0xff] }
  0x28   :  { %v132_v48 = vld [vmem:[#allocation2 + $0x240] sm:$0xff]  ;;  %v133_v49 = vld [vmem:[#allocation2 + $0x248] sm:$0xff]  ;;  %v143_v54 = vld [vmem:[#allocation2 + $0x298] sm:$0xff] }
  0x29   :  { %v140_v55 = vld [vmem:[#allocation2 + $0x280] sm:$0xff]  ;;  %v141_v56 = vld [vmem:[#allocation2 + $0x288] sm:$0xff]  ;;  %v138_v57 = vld [vmem:[#allocation2 + $0x270] sm:$0xff] }
  0x2a   :  { %542 = vadd.xlane.f32.xlu2 %v541_v33  ;;  %v601_v33 = vadd.f32 %v123_v29, %v122_v28  ;;  %v139_v58 = vld [vmem:[#allocation2 + $0x278] sm:$0xff]  ;;  %v149_v63 = vld [vmem:[#allocation2 + $0x2c8] sm:$0xff]  ;;  %v146_v0 = vld [vmem:[#allocation2 + $0x2b0] sm:$0xff] }
  0x2b   :  { %539 = vadd.xlane.f32.xlu1 %v538_v34  ;;  %v598_v34 = vadd.f32 %v121_v31, %v120_v30  ;;  %v147_v1 = vld [vmem:[#allocation2 + $0x2b8] sm:$0xff]  ;;  %v144_v2 = vld [vmem:[#allocation2 + $0x2a0] sm:$0xff]  ;;  %v145_v3 = vld [vmem:[#allocation2 + $0x2a8] sm:$0xff] }
  0x2c   :  { %536 = vadd.xlane.f32.xlu0 %v535_v35  ;;  %v130_v35 = vld [vmem:[#allocation2 + $0x230] sm:$0xff]  ;;  %v155_v8 = vld [vmem:[#allocation2 + $0x2f8] sm:$0xff]  ;;  %v152_v9 = vld [vmem:[#allocation2 + $0x2e0] sm:$0xff] }
  0x2d   :  { %v613_v41 = vadd.f32 %v131_v36, %v130_v35  ;;  %v153_v10 = vld [vmem:[#allocation2 + $0x2e8] sm:$0xff]  ;;  %v150_v11 = vld [vmem:[#allocation2 + $0x2d0] sm:$0xff]  ;;  %v151_v12 = vld [vmem:[#allocation2 + $0x2d8] sm:$0xff] }
  0x2e   :  { %v646_v17 = vadd.f32 %v153_v10, %v152_v9  ;;  %v643_v18 = vadd.f32 %v151_v12, %v150_v11  ;;  %v160_v19 = vld [vmem:[#allocation2 + $0x320] sm:$0xff]  ;;  %v161_v20 = vld [vmem:[#allocation2 + $0x328] sm:$0xff]  ;;  %v158_v21 = vld [vmem:[#allocation2 + $0x310] sm:$0xff] }
  0x2f   :  { %v159_v22 = vld [vmem:[#allocation2 + $0x318] sm:$0xff]  ;;  %v658_v28 = vadd.f32 %v161_v20, %v160_v19  ;;  %v166_v31 = vld [vmem:[#allocation2 + $0x350] sm:$0xff]  ;;  %v188_v20 = vld [vmem:[#allocation2 + $0x400] sm:$0xff] }
  0x30   :  { %v655_v29 = vadd.f32 %v159_v22, %v158_v21  ;;  %v162_v35 = vld [vmem:[#allocation2 + $0x330] sm:$0xff]  ;;  %v163_v36 = vld [vmem:[#allocation2 + $0x338] sm:$0xff]  ;;  %v189_v21 = vld [vmem:[#allocation2 + $0x408] sm:$0xff] }
  0x31   :  { %v191_v19 = vld [vmem:[#allocation2 + $0x418] sm:$0xff]  ;;  %v186_v22 = vld [vmem:[#allocation2 + $0x3f0] sm:$0xff] }
  0x32   :  { %551 = vadd.xlane.f32.xlu2 %v550_v42  ;;  %v610_v42 = vadd.f32 %v129_v38, %v128_v37 }
  0x33   :  { %548 = vadd.xlane.f32.xlu1 %v547_v43  ;;  %v607_v43 = vadd.f32 %v127_v40, %v126_v39 }
  0x34   :  { %545 = vadd.xlane.f32.xlu0 %v544_v44  ;;  %v136_v44 = vld [vmem:[#allocation2 + $0x260] sm:$0xff] }
  0x35   :  { %v622_v50 = vadd.f32 %v137_v45, %v136_v44  ;;  %v173_v44 = vld [vmem:[#allocation2 + $0x388] sm:$0xff]  ;;  %v170_v45 = vld [vmem:[#allocation2 + $0x370] sm:$0xff] }
  0x3a   :  { %560 = vadd.xlane.f32.xlu2 %v559_v51  ;;  %v619_v51 = vadd.f32 %v135_v47, %v134_v46  ;;  %v171_v46 = vld [vmem:[#allocation2 + $0x378] sm:$0xff]  ;;  %v168_v47 = vld [vmem:[#allocation2 + $0x360] sm:$0xff] }
  0x3b   :  { %557 = vadd.xlane.f32.xlu1 %v556_v52  ;;  %v616_v52 = vadd.f32 %v133_v49, %v132_v48  ;;  %v169_v48 = vld [vmem:[#allocation2 + $0x368] sm:$0xff] }
  0x3c   :  { %554 = vadd.xlane.f32.xlu0 %v553_v53  ;;  %v142_v53 = vld [vmem:[#allocation2 + $0x290] sm:$0xff] }
  0x3d   :  { %v631_v59 = vadd.f32 %v143_v54, %v142_v53  ;;  %v673_v53 = vadd.f32 %v171_v46, %v170_v45  ;;  %v670_v54 = vadd.f32 %v169_v48, %v168_v47  ;;  %v202_v48 = vld [vmem:[#allocation2 + $0x470] sm:$0xff] }
  0x42   :  { %569 = vadd.xlane.f32.xlu2 %v568_v60  ;;  %v628_v60 = vadd.f32 %v141_v56, %v140_v55  ;;  %v178_v55 = vld [vmem:[#allocation2 + $0x3b0] sm:$0xff]  ;;  %v179_v56 = vld [vmem:[#allocation2 + $0x3b8] sm:$0xff] }
  0x43   :  { %566 = vadd.xlane.f32.xlu1 %v565_v61  ;;  %v625_v61 = vadd.f32 %v139_v58, %v138_v57  ;;  %v176_v57 = vld [vmem:[#allocation2 + $0x3a0] sm:$0xff]  ;;  %v177_v58 = vld [vmem:[#allocation2 + $0x3a8] sm:$0xff] }
  0x44   :  { %563 = vadd.xlane.f32.xlu0 %v562_v62  ;;  %v148_v62 = vld [vmem:[#allocation2 + $0x2c0] sm:$0xff] }
  0x45   :  { %v640_v4 = vadd.f32 %v149_v63, %v148_v62 }
  0x4a   :  { %578 = vadd.xlane.f32.xlu2 %v577_v5  ;;  %v637_v5 = vadd.f32 %v147_v1, %v146_v0  ;;  %v685_v0 = vadd.f32 %v179_v56, %v178_v55  ;;  %v682_v1 = vadd.f32 %v177_v58, %v176_v57  ;;  %v198_v55 = vld [vmem:[#allocation2 + $0x450] sm:$0xff]  ;;  %v199_v56 = vld [vmem:[#allocation2 + $0x458] sm:$0xff] }
  0x4b   :  { %575 = vadd.xlane.f32.xlu1 %v574_v6  ;;  %v634_v6 = vadd.f32 %v145_v3, %v144_v2  ;;  %v184_v3 = vld [vmem:[#allocation2 + $0x3e0] sm:$0xff] }
  0x4c   :  { %572 = vadd.xlane.f32.xlu0 %v571_v7  ;;  %v154_v7 = vld [vmem:[#allocation2 + $0x2f0] sm:$0xff] }
  0x52   :  { %587 = vadd.xlane.f32.xlu2 %v586_v14 }
  0x53   :  { %584 = vadd.xlane.f32.xlu1 %v583_v15 }
  0x54   :  { %581 = vadd.xlane.f32.xlu0 %v580_v16  ;;  %v649_v16 = vadd.f32 %v155_v8, %v154_v7  ;;  %v180_v7 = vld [vmem:[#allocation2 + $0x3c0] sm:$0xff]  ;;  %v181_v8 = vld [vmem:[#allocation2 + $0x3c8] sm:$0xff] }
  0x5a   :  { %596 = vadd.xlane.f32.xlu2 %v595_v23  ;;  %v156_v23 = vld [vmem:[#allocation2 + $0x300] sm:$0xff] }
  0x5b   :  { %593 = vadd.xlane.f32.xlu1 %v592_v24  ;;  %v157_v24 = vld [vmem:[#allocation2 + $0x308] sm:$0xff] }
  0x5c   :  { %590 = vadd.xlane.f32.xlu0 %v589_v25  ;;  %v652_v30 = vadd.f32 %v157_v24, %v156_v23  ;;  %v187_v23 = vld [vmem:[#allocation2 + $0x3f8] sm:$0xff] }
  0x62   :  { %605 = vadd.xlane.f32.xlu2 %v604_v32  ;;  %v167_v32 = vld [vmem:[#allocation2 + $0x358] sm:$0xff] }
  0x63   :  { %602 = vadd.xlane.f32.xlu1 %v601_v33  ;;  %v164_v33 = vld [vmem:[#allocation2 + $0x340] sm:$0xff]  ;;  %v667_v40 = vadd.f32 %v167_v32, %v166_v31  ;;  %v700_v31 = vadd.f32 %v189_v21, %v188_v20  ;;  %v697_v32 = vadd.f32 %v187_v23, %v186_v22  ;;  %v214_v20 = vld [vmem:[#allocation2 + $0x4d0] sm:$0xff]  ;;  %v215_v21 = vld [vmem:[#allocation2 + $0x4d8] sm:$0xff] }
  0x64   :  { %599 = vadd.xlane.f32.xlu0 %v598_v34  ;;  %v165_v34 = vld [vmem:[#allocation2 + $0x348] sm:$0xff]  ;;  %v212_v22 = vld [vmem:[#allocation2 + $0x4c0] sm:$0xff] }
  0x65   :  { %v213_v23 = vld [vmem:[#allocation2 + $0x4c8] sm:$0xff] }
  0x6a   :  { %614 = vadd.xlane.f32.xlu2 %v613_v41  ;;  %v664_v41 = vadd.f32 %v165_v34, %v164_v33  ;;  %v196_v33 = vld [vmem:[#allocation2 + $0x440] sm:$0xff]  ;;  %v197_v34 = vld [vmem:[#allocation2 + $0x448] sm:$0xff] }
  0x6b   :  { %611 = vadd.xlane.f32.xlu1 %v610_v42  ;;  %v661_v42 = vadd.f32 %v163_v36, %v162_v35  ;;  %v194_v35 = vld [vmem:[#allocation2 + $0x430] sm:$0xff]  ;;  %v195_v36 = vld [vmem:[#allocation2 + $0x438] sm:$0xff]  ;;  %v712_v45 = vadd.f32 %v197_v34, %v196_v33 }
  0x6c   :  { %608 = vadd.xlane.f32.xlu0 %v607_v43  ;;  %v172_v43 = vld [vmem:[#allocation2 + $0x380] sm:$0xff]  ;;  %v709_v46 = vadd.f32 %v195_v36, %v194_v35  ;;  %v739_v35 = vadd.f32 %v215_v21, %v214_v20  ;;  %v736_v36 = vadd.f32 %v213_v23, %v212_v22  ;;  %v233_v23 = vld [vmem:[#allocation2 + $0x568] sm:$0xff] }
  0x6d   :  { %v232_v22 = vld [vmem:[#allocation2 + $0x560] sm:$0xff] }
  0x72   :  { %623 = vadd.xlane.f32.xlu2 %v622_v50 }
  0x73   :  { %620 = vadd.xlane.f32.xlu1 %v619_v51 }
  0x74   :  { %617 = vadd.xlane.f32.xlu0 %v616_v52  ;;  %v676_v52 = vadd.f32 %v173_v44, %v172_v43 }
  0x7a   :  { %632 = vadd.xlane.f32.xlu2 %v631_v59  ;;  %v174_v59 = vld [vmem:[#allocation2 + $0x390] sm:$0xff] }
  0x7b   :  { %629 = vadd.xlane.f32.xlu1 %v628_v60  ;;  %v175_v60 = vld [vmem:[#allocation2 + $0x398] sm:$0xff] }
  0x7c   :  { %626 = vadd.xlane.f32.xlu0 %v625_v61  ;;  %v679_v2 = vadd.f32 %v175_v60, %v174_v59 }
  0x82   :  { %641 = vadd.xlane.f32.xlu2 %v640_v4  ;;  %v185_v4 = vld [vmem:[#allocation2 + $0x3e8] sm:$0xff] }
  0x83   :  { %638 = vadd.xlane.f32.xlu1 %v637_v5  ;;  %v182_v5 = vld [vmem:[#allocation2 + $0x3d0] sm:$0xff]  ;;  %v694_v12 = vadd.f32 %v185_v4, %v184_v3  ;;  %v209_v3 = vld [vmem:[#allocation2 + $0x4a8] sm:$0xff] }
  0x84   :  { %635 = vadd.xlane.f32.xlu0 %v634_v6  ;;  %v183_v6 = vld [vmem:[#allocation2 + $0x3d8] sm:$0xff]  ;;  %v206_v4 = vld [vmem:[#allocation2 + $0x490] sm:$0xff] }
  0x85   :  { %v2133_v13 = vpop.xlane.xlu2 %521 }
  0x86   :  { %2931 = vst [vmem:[#allocation12_spill] sm:$0xff] %v2133_v13  ;;  %v2135_v14 = vpop.xlane.xlu1 %515 }
  0x87   :  { %v2137_v15 = vpop.xlane.xlu0 %509 }
  0x8a   :  { %650 = vadd.xlane.f32.xlu2 %v649_v16  ;;  %v691_v16 = vadd.f32 %v183_v6, %v182_v5  ;;  %v207_v5 = vld [vmem:[#allocation2 + $0x498] sm:$0xff]  ;;  %v204_v6 = vld [vmem:[#allocation2 + $0x480] sm:$0xff] }
  0x8b   :  { %647 = vadd.xlane.f32.xlu1 %v646_v17  ;;  %v688_v17 = vadd.f32 %v181_v8, %v180_v7  ;;  %v205_v7 = vld [vmem:[#allocation2 + $0x488] sm:$0xff] }
  0x8c   :  { %644 = vadd.xlane.f32.xlu0 %v643_v18  ;;  %v190_v18 = vld [vmem:[#allocation2 + $0x410] sm:$0xff] }
  0x8d   :  { %v2139_v25 = vpop.xlane.xlu2 %524 }
  0x8e   :  { %2932 = vst [vmem:[#allocation13_spill] sm:$0xff] %v2139_v25  ;;  %v2141_v26 = vpop.xlane.xlu1 %518 }
  0x8f   :  { %2933 = vst [vmem:[#allocation14_spill] sm:$0xff] %v2141_v26  ;;  %v2143_v27 = vpop.xlane.xlu0 %512 }
  0x92   :  { %659 = vadd.xlane.f32.xlu2 %v658_v28 }
  0x93   :  { %656 = vadd.xlane.f32.xlu1 %v655_v29 }
  0x94   :  { %653 = vadd.xlane.f32.xlu0 %v652_v30  ;;  %v703_v30 = vadd.f32 %v191_v19, %v190_v18  ;;  %v727_v18 = vadd.f32 %v207_v5, %v206_v4  ;;  %v724_v19 = vadd.f32 %v205_v7, %v204_v6  ;;  %v225_v4 = vld [vmem:[#allocation2 + $0x528] sm:$0xff]  ;;  %v222_v5 = vld [vmem:[#allocation2 + $0x510] sm:$0xff]  ;;  %v223_v6 = vld [vmem:[#allocation2 + $0x518] sm:$0xff] }
  0x95   :  { %v2145_v37 = vpop.xlane.xlu2 %533  ;;  %v751_v21 = vadd.f32 %v223_v6, %v222_v5 }
  0x96   :  { %2934 = vst [vmem:[#allocation15_spill] sm:$0xff] %v2145_v37  ;;  %v2147_v38 = vpop.xlane.xlu1 %530 }
  0x97   :  { %2935 = vst [vmem:[#allocation16_spill] sm:$0xff] %v2147_v38  ;;  %v2149_v39 = vpop.xlane.xlu0 %527 }
  0x98   :  { %2936 = vst [vmem:[#allocation17_spill] sm:$0xff] %v2149_v39 }
  0x9a   :  { %668 = vadd.xlane.f32.xlu2 %v667_v40  ;;  %v192_v40 = vld [vmem:[#allocation2 + $0x420] sm:$0xff] }
  0x9b   :  { %665 = vadd.xlane.f32.xlu1 %v664_v41  ;;  %v193_v41 = vld [vmem:[#allocation2 + $0x428] sm:$0xff] }
  0x9c   :  { %662 = vadd.xlane.f32.xlu0 %v661_v42  ;;  %v706_v47 = vadd.f32 %v193_v41, %v192_v40  ;;  %v220_v41 = vld [vmem:[#allocation2 + $0x500] sm:$0xff] }
  0x9d   :  { %v2151_v49 = vpop.xlane.xlu2 %542 }
  0x9e   :  { %2937 = vst [vmem:[#allocation18_spill] sm:$0xff] %v2151_v49  ;;  %v2153_v50 = vpop.xlane.xlu1 %539 }
  0x9f   :  { %2938 = vst [vmem:[#allocation19_spill] sm:$0xff] %v2153_v50  ;;  %v2155_v51 = vpop.xlane.xlu0 %536 }
  0xa0   :  { %2939 = vst [vmem:[#allocation20_spill] sm:$0xff] %v2155_v51 }
  0xa2   :  { %677 = vadd.xlane.f32.xlu2 %v676_v52  ;;  %v203_v52 = vld [vmem:[#allocation2 + $0x478] sm:$0xff] }
  0xa3   :  { %674 = vadd.xlane.f32.xlu1 %v673_v53  ;;  %v200_v53 = vld [vmem:[#allocation2 + $0x460] sm:$0xff]  ;;  %v721_v60 = vadd.f32 %v203_v52, %v202_v48  ;;  %v217_v52 = vld [vmem:[#allocation2 + $0x4e8] sm:$0xff] }
  0xa4   :  { %671 = vadd.xlane.f32.xlu0 %v670_v54  ;;  %v201_v54 = vld [vmem:[#allocation2 + $0x468] sm:$0xff]  ;;  %v216_v48 = vld [vmem:[#allocation2 + $0x4e0] sm:$0xff] }
  0xa5   :  { %v2157_v61 = vpop.xlane.xlu2 %551 }
  0xa6   :  { %2940 = vst [vmem:[#allocation21_spill] sm:$0xff] %v2157_v61  ;;  %v2159_v62 = vpop.xlane.xlu1 %548 }
  0xa7   :  { %2941 = vst [vmem:[#allocation22_spill] sm:$0xff] %v2159_v62  ;;  %v2161_v63 = vpop.xlane.xlu0 %545 }
  0xa8   :  { %2942 = vst [vmem:[#allocation23_spill] sm:$0xff] %v2161_v63 }
  0xaa   :  { %686 = vadd.xlane.f32.xlu2 %v685_v0  ;;  %v718_v0 = vadd.f32 %v201_v54, %v200_v53 }
  0xab   :  { %683 = vadd.xlane.f32.xlu1 %v682_v1  ;;  %v715_v1 = vadd.f32 %v199_v56, %v198_v55 }
  0xac   :  { %680 = vadd.xlane.f32.xlu0 %v679_v2  ;;  %v208_v2 = vld [vmem:[#allocation2 + $0x4a0] sm:$0xff] }
  0xad   :  { %v2163_v9 = vpop.xlane.xlu2 %560 }
  0xae   :  { %v2165_v10 = vpop.xlane.xlu1 %557 }
  0xaf   :  { %v2167_v11 = vpop.xlane.xlu0 %554 }
  0xb0   :  { %2943 = vst [vmem:[#allocation24_spill] sm:$0xff] %v2167_v11 }
  0xb2   :  { %695 = vadd.xlane.f32.xlu2 %v694_v12 }
  0xb3   :  { %692 = vadd.xlane.f32.xlu1 %v691_v16 }
  0xb4   :  { %689 = vadd.xlane.f32.xlu0 %v688_v17  ;;  %v730_v17 = vadd.f32 %v209_v3, %v208_v2  ;;  %v227_v2 = vld [vmem:[#allocation2 + $0x538] sm:$0xff]  ;;  %v224_v3 = vld [vmem:[#allocation2 + $0x520] sm:$0xff] }
  0xb5   :  { %v2169_v24 = vpop.xlane.xlu2 %569  ;;  %v754_v20 = vadd.f32 %v225_v4, %v224_v3 }
  0xb6   :  { %v2171_v28 = vpop.xlane.xlu1 %566 }
  0xb7   :  { %v2173_v29 = vpop.xlane.xlu0 %563 }
  0xba   :  { %704 = vadd.xlane.f32.xlu2 %v703_v30  ;;  %v210_v30 = vld [vmem:[#allocation2 + $0x4b0] sm:$0xff] }
  0xbb   :  { %701 = vadd.xlane.f32.xlu1 %v700_v31  ;;  %v211_v31 = vld [vmem:[#allocation2 + $0x4b8] sm:$0xff] }
  0xbc   :  { %698 = vadd.xlane.f32.xlu0 %v697_v32  ;;  %v733_v40 = vadd.f32 %v211_v31, %v210_v30  ;;  %v230_v30 = vld [vmem:[#allocation2 + $0x550] sm:$0xff]  ;;  %v231_v31 = vld [vmem:[#allocation2 + $0x558] sm:$0xff] }
  0xbd   :  { %v2175_v42 = vpop.xlane.xlu2 %578 }
  0xbe   :  { %v2177_v43 = vpop.xlane.xlu1 %575 }
  0xbf   :  { %v2179_v44 = vpop.xlane.xlu0 %572 }
  0xc2   :  { %713 = vadd.xlane.f32.xlu2 %v712_v45  ;;  %v221_v45 = vld [vmem:[#allocation2 + $0x508] sm:$0xff] }
  0xc3   :  { %710 = vadd.xlane.f32.xlu1 %v709_v46  ;;  %v218_v46 = vld [vmem:[#allocation2 + $0x4f0] sm:$0xff]  ;;  %v748_v56 = vadd.f32 %v221_v45, %v220_v41 }
  0xc4   :  { %707 = vadd.xlane.f32.xlu0 %v706_v47  ;;  %v219_v47 = vld [vmem:[#allocation2 + $0x4f8] sm:$0xff] }
  0xc5   :  { %v2181_v57 = vpop.xlane.xlu2 %587 }
  0xc6   :  { %v2183_v58 = vpop.xlane.xlu1 %584 }
  0xc7   :  { %v2185_v59 = vpop.xlane.xlu0 %581 }
  0xca   :  { %722 = vadd.xlane.f32.xlu2 %v721_v60  ;;  %v745_v60 = vadd.f32 %v219_v47, %v218_v46  ;;  %v766_v46 = vadd.f32 %v233_v23, %v232_v22  ;;  %v763_v47 = vadd.f32 %v231_v31, %v230_v30  ;;  %v245_v22 = vld [vmem:[#allocation2 + $0x5c8] sm:$0xff]  ;;  %v242_v23 = vld [vmem:[#allocation2 + $0x5b0] sm:$0xff]  ;;  %v243_v30 = vld [vmem:[#allocation2 + $0x5b8] sm:$0xff] }
  0xcb   :  { %719 = vadd.xlane.f32.xlu1 %v718_v0  ;;  %v742_v0 = vadd.f32 %v217_v52, %v216_v48  ;;  %v238_v52 = vld [vmem:[#allocation2 + $0x590] sm:$0xff]  ;;  %v240_v31 = vld [vmem:[#allocation2 + $0x5a0] sm:$0xff]  ;;  %v781_v11 = vadd.f32 %v243_v30, %v242_v23  ;;  %v255_v30 = vld [vmem:[#allocation2 + $0x618] sm:$0xff] }
  0xcc   :  { %716 = vadd.xlane.f32.xlu0 %v715_v1  ;;  %v226_v1 = vld [vmem:[#allocation2 + $0x530] sm:$0xff] }
  0xcd   :  { %v2187_v8 = vpop.xlane.xlu2 %596  ;;  %v254_v23 = vld [vmem:[#allocation2 + $0x610] sm:$0xff] }
  0xce   :  { %v2189_v12 = vpop.xlane.xlu1 %593 }
  0xcf   :  { %v2191_v16 = vpop.xlane.xlu0 %590 }
  0xd2   :  { %731 = vadd.xlane.f32.xlu2 %v730_v17 }
  0xd3   :  { %728 = vadd.xlane.f32.xlu1 %v727_v18 }
  0xd4   :  { %725 = vadd.xlane.f32.xlu0 %v724_v19  ;;  %v757_v19 = vadd.f32 %v227_v2, %v226_v1  ;;  %v234_v1 = vld [vmem:[#allocation2 + $0x570] sm:$0xff]  ;;  %v235_v2 = vld [vmem:[#allocation2 + $0x578] sm:$0xff] }
  0xd5   :  { %v2193_v32 = vpop.xlane.xlu2 %605 }
  0xd6   :  { %2944 = vst [vmem:[#allocation25_spill] sm:$0xff] %v2193_v32  ;;  %v2195_v33 = vpop.xlane.xlu1 %602 }
  0xd7   :  { %2945 = vst [vmem:[#allocation26_spill] sm:$0xff] %v2195_v33  ;;  %v2197_v34 = vpop.xlane.xlu0 %599 }
  0xd8   :  { %2946 = vst [vmem:[#allocation27_spill] sm:$0xff] %v2197_v34  ;;  %v326_v34 = vld [vmem:[#allocation2 + $0x850] sm:$0xff] }
  0xda   :  { %740 = vadd.xlane.f32.xlu2 %v739_v35  ;;  %v228_v35 = vld [vmem:[#allocation2 + $0x540] sm:$0xff] }
  0xdb   :  { %737 = vadd.xlane.f32.xlu1 %v736_v36  ;;  %v229_v36 = vld [vmem:[#allocation2 + $0x548] sm:$0xff] }
  0xdc   :  { %734 = vadd.xlane.f32.xlu0 %v733_v40  ;;  %v760_v48 = vadd.f32 %v229_v36, %v228_v35  ;;  %v241_v35 = vld [vmem:[#allocation2 + $0x5a8] sm:$0xff] }
  0xdd   :  { %v2199_v53 = vpop.xlane.xlu2 %614 }
  0xde   :  { %2947 = vst [vmem:[#allocation28_spill] sm:$0xff] %v2199_v53  ;;  %v2201_v54 = vpop.xlane.xlu1 %611 }
  0xdf   :  { %2948 = vst [vmem:[#allocation29_spill] sm:$0xff] %v2201_v54  ;;  %v2203_v55 = vpop.xlane.xlu0 %608 }
  0xe0   :  { %2949 = vst [vmem:[#allocation30_spill] sm:$0xff] %v2203_v55 }
  0xe2   :  { %749 = vadd.xlane.f32.xlu2 %v748_v56  ;;  %v239_v56 = vld [vmem:[#allocation2 + $0x598] sm:$0xff] }
  0xe3   :  { %746 = vadd.xlane.f32.xlu1 %v745_v60  ;;  %v236_v60 = vld [vmem:[#allocation2 + $0x580] sm:$0xff]  ;;  %v775_v6 = vadd.f32 %v239_v56, %v238_v52  ;;  %v778_v52 = vadd.f32 %v241_v35, %v240_v31  ;;  %v250_v56 = vld [vmem:[#allocation2 + $0x5f0] sm:$0xff]  ;;  %v253_v35 = vld [vmem:[#allocation2 + $0x608] sm:$0xff] }
  0xe4   :  { %743 = vadd.xlane.f32.xlu0 %v742_v0  ;;  %v237_v0 = vld [vmem:[#allocation2 + $0x588] sm:$0xff]  ;;  %v252_v31 = vld [vmem:[#allocation2 + $0x600] sm:$0xff] }
  0xe5   :  { %v2205_v7 = vpop.xlane.xlu2 %623 }
  0xe6   :  { %2950 = vst [vmem:[#allocation31_spill] sm:$0xff] %v2205_v7  ;;  %v2207_v17 = vpop.xlane.xlu1 %620 }
  0xe7   :  { %2951 = vst [vmem:[#allocation32_spill] sm:$0xff] %v2207_v17  ;;  %v2209_v18 = vpop.xlane.xlu0 %617 }
  0xe8   :  { %2952 = vst [vmem:[#allocation33_spill] sm:$0xff] %v2209_v18 }
  0xea   :  { %758 = vadd.xlane.f32.xlu2 %v757_v19  ;;  %v772_v19 = vadd.f32 %v237_v0, %v236_v60  ;;  %v251_v60 = vld [vmem:[#allocation2 + $0x5f8] sm:$0xff]  ;;  %v248_v0 = vld [vmem:[#allocation2 + $0x5e0] sm:$0xff] }
  0xeb   :  { %755 = vadd.xlane.f32.xlu1 %v754_v20  ;;  %v769_v20 = vadd.f32 %v235_v2, %v234_v1  ;;  %v249_v1 = vld [vmem:[#allocation2 + $0x5e8] sm:$0xff]  ;;  %v246_v2 = vld [vmem:[#allocation2 + $0x5d0] sm:$0xff]  ;;  %v793_v61 = vadd.f32 %v251_v60, %v250_v56  ;;  %v796_v56 = vadd.f32 %v253_v35, %v252_v31  ;;  %v260_v60 = vld [vmem:[#allocation2 + $0x640] sm:$0xff] }
  0xec   :  { %752 = vadd.xlane.f32.xlu0 %v751_v21  ;;  %v244_v21 = vld [vmem:[#allocation2 + $0x5c0] sm:$0xff]  ;;  %v265_v31 = vld [vmem:[#allocation2 + $0x668] sm:$0xff] }
  0xed   :  { %v2211_v40 = vpop.xlane.xlu2 %632 }
  0xee   :  { %2953 = vst [vmem:[#allocation34_spill] sm:$0xff] %v2211_v40  ;;  %v2213_v41 = vpop.xlane.xlu1 %629 }
  0xef   :  { %2954 = vst [vmem:[#allocation35_spill] sm:$0xff] %v2213_v41  ;;  %v2215_v45 = vpop.xlane.xlu0 %626  ;;  %v799_v41 = vadd.f32 %v255_v30, %v254_v23  ;;  %v267_v23 = vld [vmem:[#allocation2 + $0x678] sm:$0xff]  ;;  %v264_v30 = vld [vmem:[#allocation2 + $0x660] sm:$0xff] }
  0xf0   :  { %2955 = vst [vmem:[#allocation36_spill] sm:$0xff] %v2215_v45 }
  0xf2   :  { %767 = vadd.xlane.f32.xlu2 %v766_v46 }
  0xf3   :  { %764 = vadd.xlane.f32.xlu1 %v763_v47 }
  0xf4   :  { %761 = vadd.xlane.f32.xlu0 %v760_v48  ;;  %v784_v48 = vadd.f32 %v245_v22, %v244_v21  ;;  %v257_v22 = vld [vmem:[#allocation2 + $0x628] sm:$0xff] }
  0xf5   :  { %v2217_v3 = vpop.xlane.xlu2 %641 }
  0xf6   :  { %v2219_v4 = vpop.xlane.xlu1 %638 }
  0xf7   :  { %2956 = vst [vmem:[#allocation37_spill] sm:$0xff] %v2219_v4  ;;  %v2221_v5 = vpop.xlane.xlu0 %635 }
  0xf8   :  { %2957 = vst [vmem:[#allocation38_spill] sm:$0xff] %v2221_v5  ;;  %v790_v5 = vadd.f32 %v249_v1, %v248_v0  ;;  %v261_v0 = vld [vmem:[#allocation2 + $0x648] sm:$0xff]  ;;  %v258_v1 = vld [vmem:[#allocation2 + $0x630] sm:$0xff] }
  0xf9   :  { %v808_v45 = vadd.f32 %v261_v0, %v260_v60  ;;  %v273_v60 = vld [vmem:[#allocation2 + $0x6a8] sm:$0xff]  ;;  %v270_v0 = vld [vmem:[#allocation2 + $0x690] sm:$0xff] }
  0xfa   :  { %776 = vadd.xlane.f32.xlu2 %v775_v6  ;;  %v247_v6 = vld [vmem:[#allocation2 + $0x5d8] sm:$0xff] }
  0xfb   :  { %773 = vadd.xlane.f32.xlu1 %v772_v19  ;;  %v787_v21 = vadd.f32 %v247_v6, %v246_v2  ;;  %v259_v2 = vld [vmem:[#allocation2 + $0x638] sm:$0xff] }
  0xfc   :  { %770 = vadd.xlane.f32.xlu0 %v769_v20 }
  0xfd   :  { %v2223_v36 = vpop.xlane.xlu2 %650 }
  0xfe   :  { %v2225_v46 = vpop.xlane.xlu1 %647 }
  0xff   :  { %v2227_v47 = vpop.xlane.xlu0 %644 }
 0x102   :  { %785 = vadd.xlane.f32.xlu2 %v784_v48 }
 0x103   :  { %782 = vadd.xlane.f32.xlu1 %v781_v11  ;;  %v256_v11 = vld [vmem:[#allocation2 + $0x620] sm:$0xff] }
 0x104   :  { %779 = vadd.xlane.f32.xlu0 %v778_v52  ;;  %v802_v62 = vadd.f32 %v257_v22, %v256_v11  ;;  %v805_v11 = vadd.f32 %v259_v2, %v258_v1  ;;  %v266_v22 = vld [vmem:[#allocation2 + $0x670] sm:$0xff]  ;;  %v271_v1 = vld [vmem:[#allocation2 + $0x698] sm:$0xff] }
 0x105   :  { %v2229_v19 = vpop.xlane.xlu2 %659  ;;  %v817_v17 = vadd.f32 %v267_v23, %v266_v22  ;;  %v279_v22 = vld [vmem:[#allocation2 + $0x6d8] sm:$0xff]  ;;  %v276_v23 = vld [vmem:[#allocation2 + $0x6c0] sm:$0xff] }
 0x106   :  { %v2231_v20 = vpop.xlane.xlu1 %656 }
 0x107   :  { %v2233_v4 = vpop.xlane.xlu0 %653 }
 0x10a   :  { %794 = vadd.xlane.f32.xlu2 %v793_v61  ;;  %v262_v61 = vld [vmem:[#allocation2 + $0x650] sm:$0xff] }
 0x10b   :  { %791 = vadd.xlane.f32.xlu1 %v790_v5  ;;  %v263_v5 = vld [vmem:[#allocation2 + $0x658] sm:$0xff] }
 0x10c   :  { %788 = vadd.xlane.f32.xlu0 %v787_v21  ;;  %v811_v49 = vadd.f32 %v263_v5, %v262_v61  ;;  %v814_v61 = vadd.f32 %v265_v31, %v264_v30  ;;  %v272_v5 = vld [vmem:[#allocation2 + $0x6a0] sm:$0xff]  ;;  %v277_v30 = vld [vmem:[#allocation2 + $0x6c8] sm:$0xff] }
 0x10d   :  { %v2235_v48 = vpop.xlane.xlu2 %668  ;;  %v826_v18 = vadd.f32 %v273_v60, %v272_v5  ;;  %v285_v5 = vld [vmem:[#allocation2 + $0x708] sm:$0xff]  ;;  %v282_v60 = vld [vmem:[#allocation2 + $0x6f0] sm:$0xff] }
 0x10e   :  { %v2237_v52 = vpop.xlane.xlu1 %665 }
 0x10f   :  { %v2239_v40 = vpop.xlane.xlu0 %662 }
 0x112   :  { %803 = vadd.xlane.f32.xlu2 %v802_v62  ;;  %v268_v62 = vld [vmem:[#allocation2 + $0x680] sm:$0xff] }
 0x113   :  { %800 = vadd.xlane.f32.xlu1 %v799_v41  ;;  %v269_v41 = vld [vmem:[#allocation2 + $0x688] sm:$0xff] }
 0x114   :  { %797 = vadd.xlane.f32.xlu0 %v796_v56  ;;  %v820_v50 = vadd.f32 %v269_v41, %v268_v62  ;;  %v823_v62 = vadd.f32 %v271_v1, %v270_v0  ;;  %v278_v41 = vld [vmem:[#allocation2 + $0x6d0] sm:$0xff]  ;;  %v283_v0 = vld [vmem:[#allocation2 + $0x6f8] sm:$0xff] }
 0x115   :  { %v2241_v6 = vpop.xlane.xlu2 %677 }
 0x116   :  { %2958 = vst [vmem:[#allocation39_spill] sm:$0xff] %v2241_v6  ;;  %v2243_v21 = vpop.xlane.xlu1 %674  ;;  %v325_v6 = vld [vmem:[#allocation2 + $0x848] sm:$0xff] }
 0x117   :  { %v2245_v63 = vpop.xlane.xlu0 %671 }
 0x11a   :  { %812 = vadd.xlane.f32.xlu2 %v811_v49  ;;  %v274_v49 = vld [vmem:[#allocation2 + $0x6b0] sm:$0xff] }
 0x11b   :  { %809 = vadd.xlane.f32.xlu1 %v808_v45  ;;  %v275_v45 = vld [vmem:[#allocation2 + $0x6b8] sm:$0xff] }
 0x11c   :  { %806 = vadd.xlane.f32.xlu0 %v805_v11  ;;  %v829_v37 = vadd.f32 %v275_v45, %v274_v49  ;;  %v832_v49 = vadd.f32 %v277_v30, %v276_v23  ;;  %v284_v45 = vld [vmem:[#allocation2 + $0x700] sm:$0xff]  ;;  %v289_v23 = vld [vmem:[#allocation2 + $0x728] sm:$0xff] }
 0x11d   :  { %v2247_v35 = vpop.xlane.xlu2 %686 }
 0x11e   :  { %2959 = vst [vmem:[#allocation40_spill] sm:$0xff] %v2247_v35  ;;  %v2249_v56 = vpop.xlane.xlu1 %683 }
 0x11f   :  { %2960 = vst [vmem:[#allocation41_spill] sm:$0xff] %v2249_v56  ;;  %v2251_v7 = vpop.xlane.xlu0 %680 }
 0x120   :  { %2961 = vst [vmem:[#allocation42_spill] sm:$0xff] %v2251_v7  ;;  %v324_v7 = vld [vmem:[#allocation2 + $0x840] sm:$0xff] }
 0x122   :  { %821 = vadd.xlane.f32.xlu2 %v820_v50  ;;  %v280_v50 = vld [vmem:[#allocation2 + $0x6e0] sm:$0xff] }
 0x123   :  { %818 = vadd.xlane.f32.xlu1 %v817_v17  ;;  %v281_v17 = vld [vmem:[#allocation2 + $0x6e8] sm:$0xff] }
 0x124   :  { %815 = vadd.xlane.f32.xlu0 %v814_v61  ;;  %v838_v38 = vadd.f32 %v281_v17, %v280_v50  ;;  %v841_v50 = vadd.f32 %v283_v0, %v282_v60  ;;  %v290_v17 = vld [vmem:[#allocation2 + $0x730] sm:$0xff]  ;;  %v295_v0 = vld [vmem:[#allocation2 + $0x758] sm:$0xff] }
 0x125   :  { %v2253_v2 = vpop.xlane.xlu2 %695  ;;  %v294_v60 = vld [vmem:[#allocation2 + $0x750] sm:$0xff] }
 0x126   :  { %2962 = vst [vmem:[#allocation43_spill] sm:$0xff] %v2253_v2  ;;  %v2255_v11 = vpop.xlane.xlu1 %692  ;;  %v835_v2 = vadd.f32 %v279_v22, %v278_v41  ;;  %v291_v41 = vld [vmem:[#allocation2 + $0x738] sm:$0xff]  ;;  %v288_v22 = vld [vmem:[#allocation2 + $0x720] sm:$0xff] }
 0x127   :  { %2963 = vst [vmem:[#allocation44_spill] sm:$0xff] %v2255_v11  ;;  %v2257_v51 = vpop.xlane.xlu0 %689 }
 0x128   :  { %2964 = vst [vmem:[#allocation45_spill] sm:$0xff] %v2257_v51 }
 0x12a   :  { %830 = vadd.xlane.f32.xlu2 %v829_v37  ;;  %v286_v37 = vld [vmem:[#allocation2 + $0x710] sm:$0xff] }
 0x12b   :  { %827 = vadd.xlane.f32.xlu1 %v826_v18  ;;  %v287_v18 = vld [vmem:[#allocation2 + $0x718] sm:$0xff] }
 0x12c   :  { %824 = vadd.xlane.f32.xlu0 %v823_v62 }
 0x12d   :  { %v2259_v31 = vpop.xlane.xlu2 %704 }
 0x12e   :  { %2965 = vst [vmem:[#allocation46_spill] sm:$0xff] %v2259_v31  ;;  %v2261_v61 = vpop.xlane.xlu1 %701 }
 0x12f   :  { %2966 = vst [vmem:[#allocation47_spill] sm:$0xff] %v2261_v61  ;;  %v2263_v53 = vpop.xlane.xlu0 %698  ;;  %v847_v61 = vadd.f32 %v287_v18, %v286_v37  ;;  %v850_v37 = vadd.f32 %v289_v23, %v288_v22  ;;  %v1436_v18 = vlaneseq  ;;  %v305_v22 = vld [vmem:[#allocation2 + $0x7a8] sm:$0xff]  ;;  %v302_v23 = vld [vmem:[#allocation2 + $0x790] sm:$0xff] }
 0x130   :  { %2967 = vst [vmem:[#allocation48_spill] sm:$0xff] %v2263_v53  ;;  %v844_v53 = vadd.f32 %v285_v5, %v284_v45  ;;  %v296_v45 = vld [vmem:[#allocation2 + $0x760] sm:$0xff]  ;;  %v297_v5 = vld [vmem:[#allocation2 + $0x768] sm:$0xff] }
 0x131   :  { %v2277_v54 = vand.u32 127, %v1436_v18  ;;  %v300_v18 = vld [vmem:[#allocation2 + $0x780] sm:$0xff] }
 0x132   :  { %839 = vadd.xlane.f32.xlu2 %v838_v38  ;;  %v292_v38 = vld [vmem:[#allocation2 + $0x740] sm:$0xff] }
 0x133   :  { %836 = vadd.xlane.f32.xlu1 %v835_v2  ;;  %v293_v2 = vld [vmem:[#allocation2 + $0x748] sm:$0xff] }
 0x134   :  { %833 = vadd.xlane.f32.xlu0 %v832_v49 }
 0x135   :  { %v2265_v1 = vpop.xlane.xlu2 %713 }
 0x136   :  { %2968 = vst [vmem:[#allocation49_spill] sm:$0xff] %v2265_v1  ;;  %v2267_v62 = vpop.xlane.xlu1 %710 }
 0x137   :  { %2969 = vst [vmem:[#allocation50_spill] sm:$0xff] %v2267_v62  ;;  %v2269_v31 = vpop.xlane.xlu0 %707  ;;  %v856_v62 = vadd.f32 %v293_v2, %v292_v38  ;;  %v859_v38 = vadd.f32 %v295_v0, %v294_v60  ;;  %v2280_v2 = vadd.s32 4294967288, %v2277_v54 }
 0x138   :  { %2970 = vst [vmem:[#allocation51_spill] sm:$0xff] %v2269_v31  ;;  %v853_v31 = vadd.f32 %v291_v41, %v290_v17  ;;  %v2285_v17 = vadd.s32 4294967280, %v2277_v54  ;;  %v304_v41 = vld [vmem:[#allocation2 + $0x7a0] sm:$0xff] }
 0x139   :  { %v874_v60 = vadd.f32 %v305_v22, %v304_v41  ;;  %v311_v41 = vld [vmem:[#allocation2 + $0x7d8] sm:$0xff]  ;;  %v308_v22 = vld [vmem:[#allocation2 + $0x7c0] sm:$0xff] }
 0x13a   :  { %848 = vadd.xlane.f32.xlu2 %v847_v61  ;;  %v299_v61 = vld [vmem:[#allocation2 + $0x778] sm:$0xff] }
 0x13b   :  { %845 = vadd.xlane.f32.xlu1 %v844_v53  ;;  %v298_v53 = vld [vmem:[#allocation2 + $0x770] sm:$0xff] }
 0x13c   :  { %842 = vadd.xlane.f32.xlu0 %v841_v50  ;;  %v865_v39 = vadd.f32 %v299_v61, %v298_v53  ;;  %v301_v53 = vld [vmem:[#allocation2 + $0x788] sm:$0xff]  ;;  %v2288_v61 = vadd.s32 4294967272, %v2277_v54 }
 0x13d   :  { %v2271_v30 = vpop.xlane.xlu2 %722  ;;  %v868_v25 = vadd.f32 %v301_v53, %v300_v18  ;;  %v307_v18 = vld [vmem:[#allocation2 + $0x7b8] sm:$0xff]  ;;  %v2304_v53 = vadd.s32 4294967232, %v2277_v54 }
 0x13e   :  { %2971 = vst [vmem:[#allocation52_spill] sm:$0xff] %v2271_v30  ;;  %v2273_v49 = vpop.xlane.xlu1 %719 }
 0x13f   :  { %2972 = vst [vmem:[#allocation53_spill] sm:$0xff] %v2273_v49  ;;  %v2275_v1 = vpop.xlane.xlu0 %716 }
 0x140   :  { %2973 = vst [vmem:[#allocation54_spill] sm:$0xff] %v2275_v1  ;;  %v862_v1 = vadd.f32 %v297_v5, %v296_v45 }
 0x142   :  { %857 = vadd.xlane.f32.xlu2 %v856_v62 }
 0x143   :  { %854 = vadd.xlane.f32.xlu1 %v853_v31 }
 0x144   :  { %851 = vadd.xlane.f32.xlu0 %v850_v37  ;;  %v303_v37 = vld [vmem:[#allocation2 + $0x798] sm:$0xff] }
 0x145   :  { %v732_v50 = vpop.xlane.xlu2 %731 }
 0x146   :  { %v729_v30 = vpop.xlane.xlu1 %728 }
 0x147   :  { %v726_v49 = vpop.xlane.xlu0 %725  ;;  %v1608_v31 = vperm.slane %v729_v30, %v2280_v2  ;;  %v1610_v30 = vperm.slane %v732_v50, %v2285_v17  ;;  %v2299_v50 = vadd.s32 4294967256, %v2277_v54 }
 0x148   :  { %v1607_v62 = vperm.slane %v726_v49, %v2277_v54 }
 0x14a   :  { %866 = vadd.xlane.f32.xlu2 %v865_v39  ;;  %v1609_v39 = vsel %vm1441_vm0, %v1608_v31, %v1607_v62  ;;  %v310_v62 = vld [vmem:[#allocation2 + $0x7d0] sm:$0xff] }
 0x14b   :  { %863 = vadd.xlane.f32.xlu1 %v862_v1  ;;  %v2293_v1 = vadd.s32 4294967264, %v2277_v54  ;;  %v1611_v55 = vsel %vm1445_vm1, %v1610_v30, %v1609_v39  ;;  %v2307_v30 = vadd.s32 4294967240, %v2277_v54 }
 0x14c   :  { %860 = vadd.xlane.f32.xlu0 %v859_v38  ;;  %v871_v38 = vadd.f32 %v303_v37, %v302_v23  ;;  %v306_v37 = vld [vmem:[#allocation2 + $0x7b0] sm:$0xff] }
 0x14d   :  { %v741_v45 = vpop.xlane.xlu2 %740  ;;  %v877_v13 = vadd.f32 %v307_v18, %v306_v37  ;;  %v313_v37 = vld [vmem:[#allocation2 + $0x7e8] sm:$0xff]  ;;  %v2321_v18 = vadd.s32 4294967208, %v2277_v54 }
 0x14e   :  { %v738_v49 = vpop.xlane.xlu1 %737  ;;  %v1616_v23 = vperm.slane %v741_v45, %v2299_v50 }
 0x14f   :  { %v735_v5 = vpop.xlane.xlu0 %734  ;;  %v1614_v11 = vperm.slane %v738_v49, %v2293_v1 }
 0x150   :  { %v1612_v0 = vperm.slane %v735_v5, %v2288_v61  ;;  %v309_v5 = vld [vmem:[#allocation2 + $0x7c8] sm:$0xff] }
 0x152   :  { %v1613_v31 = vsel %vm1449_vm2, %v1612_v0, %v1611_v55  ;;  %875 = vadd.xlane.f32.xlu2 %v874_v60  ;;  %v2310_v55 = vadd.s32 4294967248, %v2277_v54  ;;  %v883_v0 = vadd.f32 %v311_v41, %v310_v62  ;;  %v317_v41 = vld [vmem:[#allocation2 + $0x808] sm:$0xff] }
 0x153   :  { %872 = vadd.xlane.f32.xlu1 %v871_v38  ;;  %v1615_v39 = vsel %vm1453_vm3, %v1614_v11, %v1613_v31  ;;  %v880_v38 = vadd.f32 %v309_v5, %v308_v22  ;;  %v316_v31 = vld [vmem:[#allocation2 + $0x800] sm:$0xff]  ;;  %v314_v22 = vld [vmem:[#allocation2 + $0x7f0] sm:$0xff]  ;;  %v315_v5 = vld [vmem:[#allocation2 + $0x7f8] sm:$0xff] }
 0x154   :  { %869 = vadd.xlane.f32.xlu0 %v868_v25  ;;  %v1617_v35 = vsel %vm1457_vm4, %v1616_v23, %v1615_v39  ;;  %v2324_v23 = vadd.s32 4294967216, %v2277_v54  ;;  %v889_v39 = vadd.f32 %v315_v5, %v314_v22  ;;  %v320_v22 = vld [vmem:[#allocation2 + $0x820] sm:$0xff]  ;;  %v321_v5 = vld [vmem:[#allocation2 + $0x828] sm:$0xff] }
 0x155   :  { %v750_v25 = vpop.xlane.xlu2 %749 }
 0x156   :  { %v747_v49 = vpop.xlane.xlu1 %746  ;;  %v1622_v45 = vperm.slane %v750_v25, %v2304_v53  ;;  %v312_v25 = vld [vmem:[#allocation2 + $0x7e0] sm:$0xff] }
 0x157   :  { %v744_v60 = vpop.xlane.xlu0 %743  ;;  %v1620_v32 = vperm.slane %v747_v49, %v2307_v30 }
 0x158   :  { %v1618_v51 = vperm.slane %v744_v60, %v2310_v55 }
 0x15a   :  { %v1619_v33 = vsel %vm1461_vm5, %v1618_v51, %v1617_v35  ;;  %884 = vadd.xlane.f32.xlu2 %v883_v0  ;;  %v2327_v51 = vadd.s32 4294967224, %v2277_v54 }
 0x15b   :  { %v1621_v11 = vsel %vm1465_vm6, %v1620_v32, %v1619_v33  ;;  %881 = vadd.xlane.f32.xlu1 %v880_v38  ;;  %v886_v38 = vadd.f32 %v313_v37, %v312_v25 }
 0x15c   :  { %878 = vadd.xlane.f32.xlu0 %v877_v13  ;;  %v1623_v62 = vsel %vm2929_vm7, %v1622_v45, %v1621_v11  ;;  %v892_v13 = vadd.f32 %v317_v41, %v316_v31  ;;  %v322_v31 = vld [vmem:[#allocation2 + $0x830] sm:$0xff]  ;;  %v323_v41 = vld [vmem:[#allocation2 + $0x838] sm:$0xff] }
 0x15d   :  { %v759_v32 = vpop.xlane.xlu2 %758 }
 0x15e   :  { %v756_v33 = vpop.xlane.xlu1 %755  ;;  %v1628_v49 = vperm.slane %v759_v32, %v2321_v18  ;;  %v318_v32 = vld [vmem:[#allocation2 + $0x810] sm:$0xff] }
 0x15f   :  { %v753_v35 = vpop.xlane.xlu0 %752  ;;  %v1626_v60 = vperm.slane %v756_v33, %v2324_v23  ;;  %v319_v33 = vld [vmem:[#allocation2 + $0x818] sm:$0xff] }
 0x160   :  { %v1624_v0 = vperm.slane %v753_v35, %v2327_v51 }
 0x162   :  { %v1625_v45 = vsel %vm2927_vm8, %v1624_v0, %v1623_v62  ;;  %893 = vadd.xlane.f32.xlu2 %v892_v13  ;;  %v901_v0 = vadd.f32 %v323_v41, %v322_v31 }
 0x163   :  { %v1627_v11 = vsel %vm2926_vm9, %v1626_v60, %v1625_v45  ;;  %890 = vadd.xlane.f32.xlu1 %v889_v39  ;;  %v895_v45 = vadd.f32 %v319_v33, %v318_v32  ;;  %v904_v33 = vadd.f32 %v325_v6, %v324_v7 }
 0x164   :  { %v2335_v56 = vsel %vm2928_vm10, %v1628_v49, %v1627_v11  ;;  %887 = vadd.xlane.f32.xlu0 %v886_v38  ;;  %v898_v49 = vadd.f32 %v321_v5, %v320_v22  ;;  %v328_v11 = vld [vmem:[#allocation2 + $0x860] sm:$0xff] }
 0x165   :  { %2974 = vst [vmem:[#allocation55_spill] sm:$0xff] %v2335_v56  ;;  %v768_v25 = vpop.xlane.xlu2 %767  ;;  %v329_v56 = vld [vmem:[#allocation2 + $0x868] sm:$0xff] }
 0x166   :  { %v1633_v37 = vperm.slane %v768_v25, %v2285_v17  ;;  %v765_v35 = vpop.xlane.xlu1 %764  ;;  %v327_v25 = vld [vmem:[#allocation2 + $0x858] sm:$0xff]  ;;  %v910_v26 = vadd.f32 %v329_v56, %v328_v11  ;;  %v332_v56 = vld [vmem:[#allocation2 + $0x880] sm:$0xff] }
 0x167   :  { %v762_v62 = vpop.xlane.xlu0 %761  ;;  %v1631_v60 = vperm.slane %v765_v35, %v2280_v2 }
 0x168   :  { %v1630_v13 = vperm.slane %v762_v62, %v2277_v54  ;;  %v907_v62 = vadd.f32 %v327_v25, %v326_v34  ;;  %v333_v34 = vld [vmem:[#allocation2 + $0x888] sm:$0xff] }
 0x169   :  { %v916_v7 = vadd.f32 %v333_v34, %v332_v56 }
 0x16a   :  { %v1632_v39 = vsel %vm1441_vm0, %v1631_v60, %v1630_v13  ;;  %902 = vadd.xlane.f32.xlu2 %v901_v0  ;;  %v334_v60 = vld [vmem:[#allocation2 + $0x890] sm:$0xff] }
 0x16b   :  { %v1634_v38 = vsel %vm1445_vm1, %v1633_v37, %v1632_v39  ;;  %899 = vadd.xlane.f32.xlu1 %v898_v49  ;;  %v335_v49 = vld [vmem:[#allocation2 + $0x898] sm:$0xff] }
 0x16c   :  { %896 = vadd.xlane.f32.xlu0 %v895_v45  ;;  %v330_v45 = vld [vmem:[#allocation2 + $0x870] sm:$0xff]  ;;  %v331_v39 = vld [vmem:[#allocation2 + $0x878] sm:$0xff] }
 0x16d   :  { %v777_v31 = vpop.xlane.xlu2 %776 }
 0x16e   :  { %v774_v41 = vpop.xlane.xlu1 %773  ;;  %v1639_v22 = vperm.slane %v777_v31, %v2299_v50 }
 0x16f   :  { %v771_v35 = vpop.xlane.xlu0 %770  ;;  %v1637_v5 = vperm.slane %v774_v41, %v2293_v1  ;;  %v919_v41 = vadd.f32 %v335_v49, %v334_v60  ;;  %v336_v60 = vld [vmem:[#allocation2 + $0x8a0] sm:$0xff]  ;;  %v337_v49 = vld [vmem:[#allocation2 + $0x8a8] sm:$0xff] }
 0x170   :  { %v1635_v32 = vperm.slane %v771_v35, %v2288_v61  ;;  %v913_v35 = vadd.f32 %v331_v39, %v330_v45 }
 0x172   :  { %v1636_v37 = vsel %vm1449_vm2, %v1635_v32, %v1634_v38  ;;  %911 = vadd.xlane.f32.xlu2 %v910_v26 }
 0x173   :  { %v1638_v0 = vsel %vm1453_vm3, %v1637_v5, %v1636_v37  ;;  %908 = vadd.xlane.f32.xlu1 %v907_v62  ;;  %v340_v5 = vld [vmem:[#allocation2 + $0x8c0] sm:$0xff]  ;;  %v338_v37 = vld [vmem:[#allocation2 + $0x8b0] sm:$0xff] }
 0x174   :  { %905 = vadd.xlane.f32.xlu0 %v904_v33  ;;  %v1640_v13 = vsel %vm1457_vm4, %v1639_v22, %v1638_v0  ;;  %v341_v33 = vld [vmem:[#allocation2 + $0x8c8] sm:$0xff]  ;;  %v339_v0 = vld [vmem:[#allocation2 + $0x8b8] sm:$0xff] }
 0x175   :  { %v786_v11 = vpop.xlane.xlu2 %785  ;;  %v925_v45 = vadd.f32 %v339_v0, %v338_v37  ;;  %v2361_v37 = vadd.s32 4294967184, %v2277_v54  ;;  %v2364_v0 = vadd.s32 4294967192, %v2277_v54 }
 0x176   :  { %v783_v25 = vpop.xlane.xlu1 %782  ;;  %v1645_v6 = vperm.slane %v786_v11, %v2304_v53 }
 0x177   :  { %v780_v31 = vpop.xlane.xlu0 %779  ;;  %v1643_v38 = vperm.slane %v783_v25, %v2307_v30  ;;  %v928_v25 = vadd.f32 %v341_v33, %v340_v5  ;;  %v342_v5 = vld [vmem:[#allocation2 + $0x8d0] sm:$0xff]  ;;  %v343_v33 = vld [vmem:[#allocation2 + $0x8d8] sm:$0xff] }
 0x178   :  { %v1641_v26 = vperm.slane %v780_v31, %v2310_v55 }
 0x17a   :  { %v1642_v62 = vsel %vm1461_vm5, %v1641_v26, %v1640_v13  ;;  %920 = vadd.xlane.f32.xlu2 %v919_v41  ;;  %v922_v41 = vadd.f32 %v337_v49, %v336_v60 }
 0x17b   :  { %v1644_v22 = vsel %vm1465_vm6, %v1643_v38, %v1642_v62  ;;  %917 = vadd.xlane.f32.xlu1 %v916_v7  ;;  %v346_v38 = vld [vmem:[#allocation2 + $0x8f0] sm:$0xff]  ;;  %v344_v62 = vld [vmem:[#allocation2 + $0x8e0] sm:$0xff] }
 0x17c   :  { %914 = vadd.xlane.f32.xlu0 %v913_v35  ;;  %v1646_v32 = vsel %vm2929_vm7, %v1645_v6, %v1644_v22  ;;  %v347_v35 = vld [vmem:[#allocation2 + $0x8f8] sm:$0xff]  ;;  %v345_v22 = vld [vmem:[#allocation2 + $0x8e8] sm:$0xff] }
 0x17d   :  { %v795_v56 = vpop.xlane.xlu2 %794 }
 0x17e   :  { %v792_v34 = vpop.xlane.xlu1 %791  ;;  %v1651_v13 = vperm.slane %v795_v56, %v2321_v18 }
 0x17f   :  { %v789_v11 = vpop.xlane.xlu0 %788  ;;  %v1649_v39 = vperm.slane %v792_v34, %v2324_v23  ;;  %v937_v34 = vadd.f32 %v347_v35, %v346_v38  ;;  %v353_v38 = vld [vmem:[#allocation2 + $0x928] sm:$0xff]  ;;  %v350_v35 = vld [vmem:[#allocation2 + $0x910] sm:$0xff] }
 0x180   :  { %v1647_v31 = vperm.slane %v789_v11, %v2327_v51  ;;  %v934_v11 = vadd.f32 %v345_v22, %v344_v62  ;;  %v351_v62 = vld [vmem:[#allocation2 + $0x918] sm:$0xff]  ;;  %v348_v22 = vld [vmem:[#allocation2 + $0x900] sm:$0xff] }
 0x182   :  { %v1648_v7 = vsel %vm2927_vm8, %v1647_v31, %v1646_v32  ;;  %929 = vadd.xlane.f32.xlu2 %v928_v25  ;;  %v2367_v32 = vadd.s32 4294967200, %v2277_v54 }
 0x183   :  { %v1650_v6 = vsel %vm2926_vm9, %v1649_v39, %v1648_v7  ;;  %926 = vadd.xlane.f32.xlu1 %v925_v45  ;;  %v931_v39 = vadd.f32 %v343_v33, %v342_v5  ;;  %v2376_v5 = vadd.s32 4294967176, %v2277_v54 }
 0x184   :  { %923 = vadd.xlane.f32.xlu0 %v922_v41  ;;  %v1652_v26 = vsel %vm2928_vm10, %v1651_v13, %v1650_v6  ;;  %v352_v6 = vld [vmem:[#allocation2 + $0x920] sm:$0xff] }
 0x185   :  { %v804_v60 = vpop.xlane.xlu2 %803 }
 0x186   :  { %v801_v49 = vpop.xlane.xlu1 %800  ;;  %v1657_v25 = vperm.slane %v804_v60, %v2361_v37  ;;  %v349_v60 = vld [vmem:[#allocation2 + $0x908] sm:$0xff] }
 0x187   :  { %v798_v56 = vpop.xlane.xlu0 %797  ;;  %v1655_v45 = vperm.slane %v801_v49, %v2364_v0  ;;  %v1554_v49 = vperm.slane %v2227_v47, %v2280_v2  ;;  %v1502_v47 = vperm.slane %v2173_v29, %v2285_v17  ;;  %v354_v29 = vld [vmem:[#allocation2 + $0x930] sm:$0xff] }
 0x188   :  { %v1653_v13 = vperm.slane %v798_v56, %v2367_v32 }
 0x18a   :  { %v1654_v31 = vsel %vm2930_vm11, %v1653_v13, %v1652_v26  ;;  %938 = vadd.xlane.f32.xlu2 %v937_v34  ;;  %v1553_v26 = vperm.slane %v2217_v3, %v2277_v54  ;;  %v1499_v3 = vperm.slane %v2165_v10, %v2277_v54  ;;  %v356_v10 = vld [vmem:[#allocation2 + $0x940] sm:$0xff] }
 0x18b   :  { %v1656_v41 = vsel %vm1489_vm12, %v1655_v45, %v1654_v31  ;;  %935 = vadd.xlane.f32.xlu1 %v934_v11  ;;  %v940_v31 = vadd.f32 %v349_v60, %v348_v22  ;;  %v357_v22 = vld [vmem:[#allocation2 + $0x948] sm:$0xff] }
 0x18c   :  { %932 = vadd.xlane.f32.xlu0 %v931_v39  ;;  %v1658_v7 = vsel %vm2925_vm13, %v1657_v25, %v1656_v41  ;;  %v946_v25 = vadd.f32 %v353_v38, %v352_v6  ;;  %v943_v39 = vadd.f32 %v351_v62, %v350_v35  ;;  %v1500_v41 = vperm.slane %v2163_v9, %v2280_v2  ;;  %v358_v35 = vld [vmem:[#allocation2 + $0x950] sm:$0xff]  ;;  %v359_v9 = vld [vmem:[#allocation2 + $0x958] sm:$0xff] }
 0x18d   :  { %v813_v33 = vpop.xlane.xlu2 %812  ;;  %v1556_v38 = vperm.slane %v2225_v46, %v2285_v17  ;;  %v1555_v62 = vsel %vm1441_vm0, %v1554_v49, %v1553_v26  ;;  %v1558_v46 = vperm.slane %v2223_v36, %v2288_v61  ;;  %v1560_v49 = vperm.slane %v2233_v4, %v2293_v1 }
 0x18e   :  { %v1662_v56 = vperm.slane %v813_v33, %v2280_v2  ;;  %v810_v34 = vpop.xlane.xlu1 %809  ;;  %v1501_v60 = vsel %vm1441_vm0, %v1500_v41, %v1499_v3  ;;  %v1506_v36 = vperm.slane %v2169_v24, %v2293_v1  ;;  %vm1904_vm13 = vcmask 1043459  }
 0x18f   :  { %v807_v11 = vpop.xlane.xlu0 %806  ;;  %v1661_v45 = vperm.slane %v810_v34, %v2277_v54  ;;  %v355_v34 = vld [vmem:[#allocation2 + $0x938] sm:$0xff]  ;;  %v1557_v26 = vsel %vm1445_vm1, %v1556_v38, %v1555_v62  ;;  %v1508_v38 = vperm.slane %v2179_v44, %v2299_v50 }
 0x190   :  { %v1659_v13 = vperm.slane %v807_v11, %v2376_v5  ;;  %v949_v3 = vadd.f32 %v355_v34, %v354_v29  ;;  %v1559_v62 = vsel %vm1449_vm2, %v1558_v46, %v1557_v26  ;;  %v362_v29 = vld [vmem:[#allocation2 + $0x970] sm:$0xff]  ;;  %v363_v44 = vld [vmem:[#allocation2 + $0x978] sm:$0xff]  ;;  %v360_v34 = vld [vmem:[#allocation2 + $0x960] sm:$0xff]  ;;  %v1564_v46 = vperm.slane %v2229_v19, %v2310_v55 }
 0x191   :  { %v1663_v33 = vsel %vm1441_vm0, %v1662_v56, %v1661_v45  ;;  %v1503_v56 = vsel %vm1445_vm1, %v1502_v47, %v1501_v60  ;;  %v365_v60 = vld [vmem:[#allocation2 + $0x988] sm:$0xff]  ;;  %v1512_v19 = vperm.slane %v2175_v42, %v2307_v30 }
 0x192   :  { %v2393_v6 = vsel %vm2924_vm14, %v1659_v13, %v1658_v7  ;;  %947 = vadd.xlane.f32.xlu2 %v946_v25  ;;  %v1504_v7 = vperm.slane %v2171_v28, %v2288_v61  ;;  %v955_v13 = vadd.f32 %v359_v9, %v358_v35  ;;  %v1562_v35 = vperm.slane %v2231_v20, %v2299_v50 }
 0x193   :  { %944 = vadd.xlane.f32.xlu1 %v943_v39  ;;  %v952_v39 = vadd.f32 %v357_v22, %v356_v10  ;;  %v364_v10 = vld [vmem:[#allocation2 + $0x980] sm:$0xff]  ;;  %v1561_v22 = vsel %vm1453_vm3, %v1560_v49, %v1559_v62  ;;  %v1510_v20 = vperm.slane %v2177_v43, %v2310_v55  ;;  %v1566_v49 = vperm.slane %v2239_v40, %v2307_v30 }
 0x194   :  { %941 = vadd.xlane.f32.xlu0 %v940_v31  ;;  %v1505_v47 = vsel %vm1449_vm2, %v1504_v7, %v1503_v56  ;;  %v361_v7 = vld [vmem:[#allocation2 + $0x968] sm:$0xff]  ;;  %v1563_v26 = vsel %vm1457_vm4, %v1562_v35, %v1561_v22  ;;  %v370_v35 = vld [vmem:[#allocation2 + $0x9b0] sm:$0xff]  ;;  %v1516_v22 = vperm.slane %v2183_v58, %v2327_v51  ;;  %vm1902_vm14 = vcmask 1042434  }
 0x195   :  { %v822_v11 = vpop.xlane.xlu2 %821 }
 0x196   :  { %v819_v25 = vpop.xlane.xlu1 %818  ;;  %v1668_v31 = vperm.slane %v822_v11, %v2293_v1 }
 0x197   :  { %v816_v45 = vpop.xlane.xlu0 %815  ;;  %v1666_v41 = vperm.slane %v819_v25, %v2288_v61 }
 0x198   :  { %v1664_v28 = vperm.slane %v816_v45, %v2285_v17 }
 0x19a   :  { %v1665_v4 = vsel %vm1445_vm1, %v1664_v28, %v1663_v33  ;;  %956 = vadd.xlane.f32.xlu2 %v955_v13  ;;  %v1507_v33 = vsel %vm1453_vm3, %v1506_v36, %v1505_v47  ;;  %v964_v13 = vadd.f32 %v365_v60, %v364_v10  ;;  %v958_v28 = vadd.f32 %v361_v7, %v360_v34  ;;  %v368_v10 = vld [vmem:[#allocation2 + $0x9a0] sm:$0xff]  ;;  %v367_v60 = vld [vmem:[#allocation2 + $0x998] sm:$0xff] }
 0x19b   :  { %v1667_v9 = vsel %vm1449_vm2, %v1666_v41, %v1665_v4  ;;  %953 = vadd.xlane.f32.xlu1 %v952_v39  ;;  %v1509_v56 = vsel %vm1457_vm4, %v1508_v38, %v1507_v33  ;;  %v961_v39 = vadd.f32 %v363_v44, %v362_v29  ;;  %v1514_v36 = vperm.slane %v2185_v59, %v2304_v53  ;;  %v369_v59 = vld [vmem:[#allocation2 + $0x9a8] sm:$0xff] }
 0x19c   :  { %950 = vadd.xlane.f32.xlu0 %v949_v3  ;;  %v1669_v24 = vsel %vm1453_vm3, %v1668_v31, %v1667_v9  ;;  %v1511_v3 = vsel %vm1461_vm5, %v1510_v20, %v1509_v56  ;;  %v1568_v47 = vperm.slane %v2237_v52, %v2304_v53  ;;  %v1565_v38 = vsel %vm1461_vm5, %v1564_v46, %v1563_v26  ;;  %v371_v9 = vld [vmem:[#allocation2 + $0x9b8] sm:$0xff] }
 0x19d   :  { %v831_v11 = vpop.xlane.xlu2 %830  ;;  %v1567_v62 = vsel %vm1465_vm6, %v1566_v49, %v1565_v38  ;;  %v1513_v52 = vsel %vm1465_vm6, %v1512_v19, %v1511_v3  ;;  %v1440_v29 = vperm.slane %v2143_v27, %v2280_v2  ;;  %v1570_v33 = vperm.slane %v2235_v48, %v2327_v51  ;;  %v376_v3 = vld [vmem:[#allocation2 + $0x9e0] sm:$0xff] }
 0x19e   :  { %v828_v25 = vpop.xlane.xlu1 %827  ;;  %v1674_v31 = vperm.slane %v831_v11, %v2307_v30  ;;  %v1515_v44 = vsel %vm2929_vm7, %v1514_v36, %v1513_v52  ;;  %v1569_v7 = vsel %vm2929_vm7, %v1568_v47, %v1567_v62  ;;  %v1572_v20 = vperm.slane %v2245_v63, %v2324_v23  ;;  %v377_v36 = vld [vmem:[#allocation2 + $0x9e8] sm:$0xff]  ;;  %v375_v62 = vld [vmem:[#allocation2 + $0x9d8] sm:$0xff] }
 0x19f   :  { %v825_v45 = vpop.xlane.xlu0 %824  ;;  %v1672_v41 = vperm.slane %v828_v25, %v2310_v55  ;;  %v973_v46 = vadd.f32 %v371_v9, %v370_v35  ;;  %v970_v11 = vadd.f32 %v369_v59, %v368_v10  ;;  %v1518_v48 = vperm.slane %v2181_v57, %v2324_v23  ;;  %v2976_v38 = vld [vmem:[#allocation39_spill] sm:$0xff]  ;;  %v2977_v35 = vld [vmem:[#allocation42_spill] sm:$0xff] }
 0x1a0   :  { %v1670_v43 = vperm.slane %v825_v45, %v2299_v50  ;;  %v1517_v45 = vsel %vm2927_vm8, %v1516_v22, %v1515_v44  ;;  %v1522_v63 = vperm.slane %v2189_v12, %v2277_v54  ;;  %v1438_v57 = vperm.slane %v2137_v15, %v2277_v54  ;;  %v373_v9 = vld [vmem:[#allocation2 + $0x9c8] sm:$0xff] }
 0x1a1   :  { %v1444_v12 = vperm.slane %v2135_v14, %v2285_v17  ;;  %v1519_v47 = vsel %vm2926_vm9, %v1518_v48, %v1517_v45  ;;  %v1577_v14 = vperm.slane %v2977_v35, %v2280_v2  ;;  %v2978_v22 = vld [vmem:[#allocation27_spill] sm:$0xff]  ;;  %v2985_v35 = vld [vmem:[#allocation25_spill] sm:$0xff] }
 0x1a2   :  { %v1671_v40 = vsel %vm1457_vm4, %v1670_v43, %v1669_v24  ;;  %965 = vadd.xlane.f32.xlu2 %v964_v13  ;;  %v366_v24 = vld [vmem:[#allocation2 + $0x990] sm:$0xff]  ;;  %v1523_v13 = vperm.slane %v2187_v8, %v2280_v2  ;;  %v1442_v15 = vsel %vm1441_vm0, %v1440_v29, %v1438_v57  ;;  %v1525_v52 = vperm.slane %v2978_v22, %v2285_v17  ;;  %v2981_v45 = vld [vmem:[#allocation55_spill] sm:$0xff] }
 0x1a3   :  { %v1673_v4 = vsel %vm1461_vm5, %v1672_v41, %v1671_v40  ;;  %962 = vadd.xlane.f32.xlu1 %v961_v39  ;;  %v967_v25 = vadd.f32 %v367_v60, %v366_v24  ;;  %v1520_v39 = vperm.slane %v2191_v16, %v2321_v18  ;;  %v1571_v41 = vsel %vm2927_vm8, %v1570_v33, %v1569_v7  ;;  %v2975_v16 = vld [vmem:[#allocation14_spill] sm:$0xff]  ;;  %v374_v40 = vld [vmem:[#allocation2 + $0x9d0] sm:$0xff] }
 0x1a4   :  { %959 = vadd.xlane.f32.xlu0 %v958_v28  ;;  %v1675_v42 = vsel %vm1465_vm6, %v1674_v31, %v1673_v4  ;;  %v1574_v31 = vperm.slane %v2243_v21, %v2321_v18  ;;  %v1573_v28 = vsel %vm2926_vm9, %v1572_v20, %v1571_v41  ;;  %v1448_v19 = vperm.slane %v2975_v16, %v2288_v61  ;;  %v2979_v29 = vld [vmem:[#allocation41_spill] sm:$0xff]  ;;  %v2982_v41 = vld [vmem:[#allocation40_spill] sm:$0xff] }
 0x1a5   :  { %v840_v34 = vpop.xlane.xlu2 %839  ;;  %v1576_v4 = vperm.slane %v2976_v38, %v2277_v54  ;;  %v1524_v10 = vsel %vm1441_vm0, %v1523_v13, %v1522_v63  ;;  %v1521_v59 = vsel %vm2928_vm10, %v1520_v39, %v1519_v47  ;;  %v1579_v44 = vperm.slane %v2979_v29, %v2285_v17  ;;  %v397_v16 = vld [vmem:[#allocation2 + $0xa88] sm:$0xff]  ;;  %v378_v47 = vld [vmem:[#allocation2 + $0x9f0] sm:$0xff]  ;;  %v379_v38 = vld [vmem:[#allocation2 + $0x9f8] sm:$0xff] }
 0x1a6   :  { %v837_v56 = vpop.xlane.xlu1 %836  ;;  %v1680_v26 = vperm.slane %v840_v34, %v2324_v23  ;;  %v1575_v24 = vsel %vm2928_vm10, %v1574_v31, %v1573_v28  ;;  %v982_v20 = vadd.f32 %v377_v36, %v376_v3  ;;  %v1446_v39 = vsel %vm1445_vm1, %v1444_v12, %v1442_v15  ;;  %v396_v28 = vld [vmem:[#allocation2 + $0xa80] sm:$0xff]  ;;  %v381_v36 = vld [vmem:[#allocation2 + $0xa08] sm:$0xff] }
 0x1a7   :  { %v834_v58 = vpop.xlane.xlu0 %833  ;;  %v1678_v49 = vperm.slane %v837_v56, %v2327_v51  ;;  %v1526_v31 = vsel %vm1445_vm1, %v1525_v52, %v1524_v10  ;;  %v380_v3 = vld [vmem:[#allocation2 + $0xa00] sm:$0xff]  ;;  %v1012_v29 = vadd.f32 %v397_v16, %v396_v28 }
 0x1a8   :  { %v1676_v27 = vperm.slane %v834_v58, %v2304_v53  ;;  %v400_v16 = vld [vmem:[#allocation2 + $0xaa0] sm:$0xff] }
 0x1aa   :  { %v1677_v43 = vsel %vm2929_vm7, %v1676_v27, %v1675_v42  ;;  %974 = vadd.xlane.f32.xlu2 %v973_v46  ;;  %v372_v42 = vld [vmem:[#allocation2 + $0x9c0] sm:$0xff]  ;;  %v979_v46 = vadd.f32 %v375_v62, %v374_v40  ;;  %v1914_v27 = vsel %vm1900_vm15, %v1575_v24, %v1521_v59  ;;  %v2984_v40 = vld [vmem:[#allocation45_spill] sm:$0xff]  ;;  %v2987_v59 = vld [vmem:[#allocation44_spill] sm:$0xff] }
 0x1ab   :  { %v1679_v8 = vsel %vm2927_vm8, %v1678_v49, %v1677_v43  ;;  %971 = vadd.xlane.f32.xlu1 %v970_v11  ;;  %v976_v11 = vadd.f32 %v373_v9, %v372_v42  ;;  %v1915_v13 = vsel %vm1902_vm14, %v2981_v45, %v1914_v27  ;;  %v1581_v43 = vperm.slane %v2982_v41, %v2288_v61  ;;  %v2986_v42 = vld [vmem:[#allocation30_spill] sm:$0xff] }
 0x1ac   :  { %968 = vadd.xlane.f32.xlu0 %v967_v25  ;;  %v1681_v21 = vsel %vm2926_vm9, %v1680_v26, %v1679_v8  ;;  %v2980_v26 = vld [vmem:[#allocation26_spill] sm:$0xff]  ;;  %v1578_v25 = vsel %vm1441_vm0, %v1577_v14, %v1576_v4  ;;  %v1583_v15 = vperm.slane %v2984_v40, %v2293_v1  ;;  %v1450_v4 = vsel %vm1449_vm2, %v1448_v19, %v1446_v39 }
 0x1ad   :  { %v849_v60 = vpop.xlane.xlu2 %848  ;;  %v1527_v49 = vperm.slane %v2980_v26, %v2288_v61  ;;  %v1580_v8 = vsel %vm1445_vm1, %v1579_v44, %v1578_v25  ;;  %v1529_v14 = vperm.slane %v2985_v35, %v2293_v1  ;;  %v1531_v9 = vperm.slane %v2986_v42, %v2299_v50  ;;  %v452_v41 = vld [vmem:[#allocation2 + $0xc40] sm:$0xff] }
 0x1ae   :  { %v1685_v33 = vperm.slane %v849_v60, %v2280_v2  ;;  %v846_v34 = vpop.xlane.xlu1 %845  ;;  %v1585_v22 = vperm.slane %v2987_v59, %v2299_v50  ;;  %v1582_v52 = vsel %vm1449_vm2, %v1581_v43, %v1580_v8  ;;  %v988_v44 = vadd.f32 %v381_v36, %v380_v3  ;;  %v453_v8 = vld [vmem:[#allocation2 + $0xc48] sm:$0xff] }
 0x1af   :  { %v843_v7 = vpop.xlane.xlu0 %842  ;;  %v1684_v56 = vperm.slane %v846_v34, %v2277_v54  ;;  %v1528_v62 = vsel %vm1449_vm2, %v1527_v49, %v1526_v31  ;;  %v2990_v49 = vld [vmem:[#allocation29_spill] sm:$0xff]  ;;  %v401_v3 = vld [vmem:[#allocation2 + $0xaa8] sm:$0xff] }
 0x1b0   :  { %v1682_v58 = vperm.slane %v843_v7, %v2321_v18  ;;  %v985_v7 = vadd.f32 %v379_v38, %v378_v47  ;;  %v1533_v27 = vperm.slane %v2990_v49, %v2310_v55  ;;  %v1530_v25 = vsel %vm1453_vm3, %v1529_v14, %v1528_v62  ;;  %v399_v47 = vld [vmem:[#allocation2 + $0xa98] sm:$0xff] }
 0x1b1   :  { %v1686_v48 = vsel %vm1441_vm0, %v1685_v33, %v1684_v56  ;;  %v2995_v62 = vld [vmem:[#allocation33_spill] sm:$0xff] }
 0x1b2   :  { %v1683_v63 = vsel %vm2928_vm10, %v1682_v58, %v1681_v21  ;;  %983 = vadd.xlane.f32.xlu2 %v982_v20  ;;  %v2983_v21 = vld [vmem:[#allocation12_spill] sm:$0xff]  ;;  %v2988_v20 = vld [vmem:[#allocation13_spill] sm:$0xff]  ;;  %v1537_v42 = vperm.slane %v2995_v62, %v2304_v53 }
 0x1b3   :  { %v2511_v57 = vsel %vm1904_vm13, %v1683_v63, %v1915_v13  ;;  %980 = vadd.xlane.f32.xlu1 %v979_v46  ;;  %v1452_v12 = vperm.slane %v2983_v21, %v2293_v1  ;;  %v1456_v56 = vperm.slane %v2988_v20, %v2299_v50  ;;  %v1584_v46 = vsel %vm1453_vm3, %v1583_v15, %v1582_v52  ;;  %v2991_v63 = vld [vmem:[#allocation43_spill] sm:$0xff]  ;;  %v398_v15 = vld [vmem:[#allocation2 + $0xa90] sm:$0xff] }
 0x1b4   :  { %977 = vadd.xlane.f32.xlu0 %v976_v11  ;;  %v2989_v11 = vld [vmem:[#allocation17_spill] sm:$0xff]  ;;  %v1532_v13 = vsel %vm1457_vm4, %v1531_v9, %v1530_v25  ;;  %v1587_v39 = vperm.slane %v2991_v63, %v2310_v55  ;;  %v1586_v43 = vsel %vm1457_vm4, %v1585_v22, %v1584_v46  ;;  %v2998_v46 = vld [vmem:[#allocation20_spill] sm:$0xff] }
 0x1b5   :  { %v858_v10 = vpop.xlane.xlu2 %857  ;;  %v1454_v58 = vsel %vm1453_vm3, %v1452_v12, %v1450_v4  ;;  %v1460_v26 = vperm.slane %v2989_v11, %v2310_v55  ;;  %v2993_v12 = vld [vmem:[#allocation48_spill] sm:$0xff]  ;;  %v1534_v14 = vsel %vm1461_vm5, %v1533_v27, %v1532_v13  ;;  %v1472_v11 = vperm.slane %v2998_v46, %v2327_v51  ;;  %v3000_v13 = vld [vmem:[#allocation46_spill] sm:$0xff] }
 0x1b6   :  { %v855_v24 = vpop.xlane.xlu1 %854  ;;  %v1691_v19 = vperm.slane %v858_v10, %v2293_v1  ;;  %v1458_v21 = vsel %vm1457_vm4, %v1456_v56, %v1454_v58  ;;  %v1589_v40 = vperm.slane %v2993_v12, %v2307_v30  ;;  %v2994_v4 = vld [vmem:[#allocation28_spill] sm:$0xff]  ;;  %v2996_v10 = vld [vmem:[#allocation47_spill] sm:$0xff]  ;;  %v1588_v22 = vsel %vm1461_vm5, %v1587_v39, %v1586_v43 }
 0x1b7   :  { %v852_v60 = vpop.xlane.xlu0 %851  ;;  %v1689_v33 = vperm.slane %v855_v24, %v2288_v61  ;;  %v1462_v38 = vsel %vm1461_vm5, %v1460_v26, %v1458_v21  ;;  %v1535_v35 = vperm.slane %v2994_v4, %v2307_v30  ;;  %v1591_v59 = vperm.slane %v2996_v10, %v2304_v53  ;;  %v2999_v26 = vld [vmem:[#allocation32_spill] sm:$0xff]  ;;  %v3002_v21 = vld [vmem:[#allocation51_spill] sm:$0xff] }
 0x1b8   :  { %v1687_v34 = vperm.slane %v852_v60, %v2285_v17  ;;  %v1096_v60 = vadd.f32 %v453_v8, %v452_v41  ;;  %v1590_v58 = vsel %vm1465_vm6, %v1589_v40, %v1588_v22  ;;  %v1539_v49 = vperm.slane %v2999_v26, %v2327_v51  ;;  %v457_v8 = vld [vmem:[#allocation2 + $0xc68] sm:$0xff]  ;;  %v454_v40 = vld [vmem:[#allocation2 + $0xc50] sm:$0xff] }
 0x1b9   :  { %v1536_v27 = vsel %vm1465_vm6, %v1535_v35, %v1534_v14  ;;  %v1593_v63 = vperm.slane %v3000_v13, %v2327_v51  ;;  %v1592_v41 = vsel %vm2929_vm7, %v1591_v59, %v1590_v58  ;;  %v1595_v12 = vperm.slane %v3002_v21, %v2324_v23  ;;  %v3004_v14 = vld [vmem:[#allocation36_spill] sm:$0xff]  ;;  %v3007_v58 = vld [vmem:[#allocation23_spill] sm:$0xff] }
 0x1ba   :  { %v1688_v45 = vsel %vm1445_vm1, %v1687_v34, %v1686_v48  ;;  %1013 = vadd.xlane.f32.xlu2 %v1012_v29  ;;  %v2992_v48 = vld [vmem:[#allocation16_spill] sm:$0xff]  ;;  %v1018_v29 = vadd.f32 %v401_v3, %v400_v16  ;;  %v1015_v34 = vadd.f32 %v399_v47, %v398_v15  ;;  %v403_v3 = vld [vmem:[#allocation2 + $0xab8] sm:$0xff]  ;;  %v1543_v62 = vperm.slane %v3004_v14, %v2321_v18 }
 0x1bb   :  { %v1690_v31 = vsel %vm1449_vm2, %v1689_v33, %v1688_v45  ;;  %989 = vadd.xlane.f32.xlu1 %v988_v44  ;;  %v1464_v36 = vperm.slane %v2992_v48, %v2307_v30  ;;  %v1538_v45 = vsel %vm2929_vm7, %v1537_v42, %v1536_v27  ;;  %v402_v16 = vld [vmem:[#allocation2 + $0xab0] sm:$0xff]  ;;  %v455_v15 = vld [vmem:[#allocation2 + $0xc58] sm:$0xff]  ;;  %v1594_v59 = vsel %vm2927_vm8, %v1593_v63, %v1592_v41 }
 0x1bc   :  { %986 = vadd.xlane.f32.xlu0 %v985_v7  ;;  %v1692_v28 = vsel %vm1453_vm3, %v1691_v19, %v1690_v31  ;;  %v2997_v7 = vld [vmem:[#allocation15_spill] sm:$0xff]  ;;  %v1540_v35 = vsel %vm2927_vm8, %v1539_v49, %v1538_v45  ;;  %v1484_v46 = vperm.slane %v3007_v58, %v2367_v32  ;;  %v3009_v45 = vld [vmem:[#allocation49_spill] sm:$0xff] }
 0x1bd   :  { %v867_v9 = vpop.xlane.xlu2 %866  ;;  %v1468_v20 = vperm.slane %v2997_v7, %v2304_v53  ;;  %v1466_v56 = vsel %vm1465_vm6, %v1464_v36, %v1462_v38  ;;  %v456_v31 = vld [vmem:[#allocation2 + $0xc60] sm:$0xff]  ;;  %v1599_v13 = vperm.slane %v3009_v45, %v2367_v32 }
 0x1be   :  { %v864_v52 = vpop.xlane.xlu1 %863  ;;  %v1697_v44 = vperm.slane %v867_v9, %v2307_v30  ;;  %v3003_v38 = vld [vmem:[#allocation31_spill] sm:$0xff]  ;;  %v3005_v9 = vld [vmem:[#allocation50_spill] sm:$0xff] }
 0x1bf   :  { %v861_v24 = vpop.xlane.xlu0 %860  ;;  %v1695_v19 = vperm.slane %v864_v52, %v2310_v55  ;;  %v1470_v36 = vsel %vm2929_vm7, %v1468_v20, %v1466_v56  ;;  %v1541_v4 = vperm.slane %v3003_v38, %v2324_v23  ;;  %v1597_v10 = vperm.slane %v3005_v9, %v2321_v18 }
 0x1c0   :  { %v1693_v33 = vperm.slane %v861_v24, %v2299_v50  ;;  %v1474_v47 = vsel %vm2927_vm8, %v1472_v11, %v1470_v36  ;;  %v1102_v24 = vadd.f32 %v457_v8, %v456_v31  ;;  %v1596_v56 = vsel %vm2926_vm9, %v1595_v12, %v1594_v59  ;;  %v3008_v11 = vld [vmem:[#allocation35_spill] sm:$0xff]  ;;  %v407_v8 = vld [vmem:[#allocation2 + $0xad8] sm:$0xff] }
 0x1c1   :  { %v1545_v26 = vperm.slane %v3008_v11, %v2367_v32  ;;  %v1542_v49 = vsel %vm2926_vm9, %v1541_v4, %v1540_v35  ;;  %v1598_v31 = vsel %vm2928_vm10, %v1597_v10, %v1596_v56  ;;  %v3011_v36 = vld [vmem:[#allocation54_spill] sm:$0xff]  ;;  %v3016_v56 = vld [vmem:[#allocation37_spill] sm:$0xff] }
 0x1c2   :  { %v1694_v25 = vsel %vm1457_vm4, %v1693_v33, %v1692_v28  ;;  %1097 = vadd.xlane.f32.xlu2 %v1096_v60  ;;  %v3001_v28 = vld [vmem:[#allocation19_spill] sm:$0xff]  ;;  %v1021_v60 = vadd.f32 %v403_v3, %v402_v16  ;;  %v1099_v33 = vadd.f32 %v455_v15, %v454_v40  ;;  %v458_v16 = vld [vmem:[#allocation2 + $0xc70] sm:$0xff]  ;;  %v459_v3 = vld [vmem:[#allocation2 + $0xc78] sm:$0xff]  ;;  %v1601_v21 = vperm.slane %v3011_v36, %v2364_v0 }
 0x1c3   :  { %v1696_v39 = vsel %vm1461_vm5, %v1695_v19, %v1694_v25  ;;  %1019 = vadd.xlane.f32.xlu1 %v1018_v29  ;;  %v1476_v48 = vperm.slane %v3001_v28, %v2324_v23  ;;  %v1544_v25 = vsel %vm2928_vm10, %v1543_v62, %v1542_v49  ;;  %v404_v12 = vld [vmem:[#allocation2 + $0xac0] sm:$0xff]  ;;  %v405_v40 = vld [vmem:[#allocation2 + $0xac8] sm:$0xff]  ;;  %v1600_v10 = vsel %vm2930_vm11, %v1599_v13, %v1598_v31  ;;  %v462_v31 = vld [vmem:[#allocation2 + $0xc90] sm:$0xff] }
 0x1c4   :  { %1016 = vadd.xlane.f32.xlu0 %v1015_v34  ;;  %v1698_v43 = vsel %vm1465_vm6, %v1697_v44, %v1696_v39  ;;  %v3006_v34 = vld [vmem:[#allocation18_spill] sm:$0xff]  ;;  %v406_v39 = vld [vmem:[#allocation2 + $0xad0] sm:$0xff]  ;;  %v1546_v4 = vsel %vm2930_vm11, %v1545_v26, %v1544_v25  ;;  %v1551_v58 = vperm.slane %v3016_v56, %v2376_v5 }
 0x1c5   :  { %v876_v42 = vpop.xlane.xlu2 %875  ;;  %v1480_v7 = vperm.slane %v3006_v34, %v2321_v18  ;;  %v1478_v20 = vsel %vm2926_vm9, %v1476_v48, %v1474_v47  ;;  %v3012_v47 = vld [vmem:[#allocation34_spill] sm:$0xff]  ;;  %v3017_v26 = vld [vmem:[#allocation24_spill] sm:$0xff] }
 0x1c6   :  { %v873_v22 = vpop.xlane.xlu1 %872  ;;  %v1703_v29 = vperm.slane %v876_v42, %v2324_v23  ;;  %v1547_v38 = vperm.slane %v3012_v47, %v2364_v0  ;;  %v3013_v35 = vld [vmem:[#allocation38_spill] sm:$0xff]  ;;  %v3014_v42 = vld [vmem:[#allocation53_spill] sm:$0xff]  ;;  %v1496_v49 = vperm.slane %v3017_v26, %v2376_v5  ;;  %v3019_v25 = vld [vmem:[#allocation52_spill] sm:$0xff] }
 0x1c7   :  { %v870_v52 = vpop.xlane.xlu0 %869  ;;  %v1701_v44 = vperm.slane %v873_v22, %v2327_v51  ;;  %v1482_v48 = vsel %vm2928_vm10, %v1480_v7, %v1478_v20  ;;  %v1549_v14 = vperm.slane %v3013_v35, %v2361_v37  ;;  %v1603_v9 = vperm.slane %v3014_v42, %v2361_v37 }
 0x1c8   :  { %v1699_v19 = vperm.slane %v870_v52, %v2304_v53  ;;  %v1486_v15 = vsel %vm2930_vm11, %v1484_v46, %v1482_v48  ;;  %v1027_v52 = vadd.f32 %v407_v8, %v406_v39  ;;  %v1602_v7 = vsel %vm1489_vm12, %v1601_v21, %v1600_v10  ;;  %v463_v8 = vld [vmem:[#allocation2 + $0xc98] sm:$0xff] }
 0x1c9   :  { %v1548_v46 = vsel %vm1489_vm12, %v1547_v38, %v1546_v4  ;;  %v1605_v45 = vperm.slane %v3019_v25, %v2376_v5  ;;  %v1111_v47 = vadd.f32 %v463_v8, %v462_v31  ;;  %v432_v25 = vld [vmem:[#allocation2 + $0xba0] sm:$0xff]  ;;  %v465_v8 = vld [vmem:[#allocation2 + $0xca8] sm:$0xff] }
 0x1ca   :  { %v1700_v27 = vsel %vm2929_vm7, %v1699_v19, %v1698_v43  ;;  %1103 = vadd.xlane.f32.xlu2 %v1102_v24  ;;  %v3010_v43 = vld [vmem:[#allocation22_spill] sm:$0xff]  ;;  %v1105_v24 = vadd.f32 %v459_v3, %v458_v16  ;;  %v1024_v19 = vadd.f32 %v405_v40, %v404_v12  ;;  %v409_v16 = vld [vmem:[#allocation2 + $0xae8] sm:$0xff] }
 0x1cb   :  { %v1702_v63 = vsel %vm2927_vm8, %v1701_v44, %v1700_v27  ;;  %1022 = vadd.xlane.f32.xlu1 %v1021_v60  ;;  %v1488_v28 = vperm.slane %v3010_v43, %v2364_v0  ;;  %v460_v3 = vld [vmem:[#allocation2 + $0xc80] sm:$0xff]  ;;  %v461_v43 = vld [vmem:[#allocation2 + $0xc88] sm:$0xff] }
 0x1cc   :  { %1100 = vadd.xlane.f32.xlu0 %v1099_v33  ;;  %v1704_v41 = vsel %vm2926_vm9, %v1703_v29, %v1702_v63  ;;  %v3015_v33 = vld [vmem:[#allocation21_spill] sm:$0xff]  ;;  %vm3018_vm9 = vcmask 982912   ;;  %v464_v31 = vld [vmem:[#allocation2 + $0xca0] sm:$0xff] }
 0x1cd   :  { %v885_v62 = vpop.xlane.xlu2 %884  ;;  %v1492_v34 = vperm.slane %v3015_v33, %v2361_v37  ;;  %v1490_v20 = vsel %vm1489_vm12, %v1488_v28, %v1486_v15  ;;  %v1550_v27 = vsel %vm3018_vm9, %v1549_v14, %v1548_v46  ;;  %vm3020_vm8 = vmmov %vm3018_vm9  ;;  %vm3022_vm9 = vcmask 1048512  }
 0x1ce   :  { %v882_v59 = vpop.xlane.xlu1 %881  ;;  %v1709_v60 = vperm.slane %v885_v62, %v2364_v0  ;;  %v1604_v63 = vsel %vm3020_vm8, %v1603_v9, %v1602_v7  ;;  %v1552_v48 = vsel %vm3022_vm9, %v1551_v58, %v1550_v27  ;;  %vm3023_vm7 = vmmov %vm3022_vm9  ;;  %v1108_v14 = vadd.f32 %v461_v43, %v460_v3 }
 0x1cf   :  { %v879_v22 = vpop.xlane.xlu0 %878  ;;  %v1707_v29 = vperm.slane %v882_v59, %v2367_v32 }
 0x1d0   :  { %v1705_v44 = vperm.slane %v879_v22, %v2321_v18  ;;  %v430_v22 = vld [vmem:[#allocation2 + $0xb90] sm:$0xff] }
 0x1d2   :  { %v1706_v11 = vsel %vm2928_vm10, %v1705_v44, %v1704_v41  ;;  %1028 = vadd.xlane.f32.xlu2 %v1027_v52  ;;  %v408_v41 = vld [vmem:[#allocation2 + $0xae0] sm:$0xff]  ;;  %vm3021_vm10 = vmmov %vm3020_vm8  ;;  %vm1906_vm8 = vcmask 1044484   ;;  %v431_v52 = vld [vmem:[#allocation2 + $0xb98] sm:$0xff] }
 0x1d3   :  { %v1708_v13 = vsel %vm2930_vm11, %v1707_v29, %v1706_v11  ;;  %1106 = vadd.xlane.f32.xlu1 %v1105_v24  ;;  %v1494_v28 = vsel %vm3021_vm10, %v1492_v34, %v1490_v20  ;;  %vm3024_vm11 = vmmov %vm3023_vm7  ;;  %v1030_v35 = vadd.f32 %v409_v16, %v408_v41  ;;  %v428_v24 = vld [vmem:[#allocation2 + $0xb80] sm:$0xff]  ;;  %v410_v44 = vld [vmem:[#allocation2 + $0xaf0] sm:$0xff] }
 0x1d4   :  { %1025 = vadd.xlane.f32.xlu0 %v1024_v19  ;;  %v1710_v39 = vsel %vm1489_vm12, %v1709_v60, %v1708_v13  ;;  %v1498_v21 = vsel %vm3023_vm7, %v1496_v49, %v1494_v28  ;;  %v1606_v12 = vsel %vm3024_vm11, %v1605_v45, %v1604_v63  ;;  %v429_v60 = vld [vmem:[#allocation2 + $0xb88] sm:$0xff]  ;;  %v411_v19 = vld [vmem:[#allocation2 + $0xaf8] sm:$0xff]  ;;  %v412_v63 = vld [vmem:[#allocation2 + $0xb00] sm:$0xff]  ;;  %vm3025_vm11 = vcmask 589312  }
 0x1d5   :  { %v894_v36 = vpop.xlane.xlu2 %893  ;;  %v1901_v62 = vsel %vm1900_vm15, %v1552_v48, %v1498_v21  ;;  %v1060_v56 = vadd.f32 %v429_v60, %v428_v24  ;;  %v1033_v26 = vadd.f32 %v411_v19, %v410_v44  ;;  %v433_v13 = vld [vmem:[#allocation2 + $0xba8] sm:$0xff]  ;;  %vm3028_vm15 = vcmask 786112   ;;  %vm3029_vm9 = vmmov %vm3025_vm11 }
 0x1d6   :  { %v891_v40 = vpop.xlane.xlu1 %890  ;;  %v1903_v42 = vsel %vm1902_vm14, %v1606_v12, %v1901_v62  ;;  %v1715_v33 = vperm.slane %v894_v36, %v2277_v54  ;;  %v1066_v43 = vadd.f32 %v433_v13, %v432_v25  ;;  %v1114_v12 = vadd.f32 %v465_v8, %v464_v31  ;;  %v466_v62 = vld [vmem:[#allocation2 + $0xcb0] sm:$0xff] }
 0x1d7   :  { %v888_v15 = vpop.xlane.xlu0 %887  ;;  %v1713_v38 = vperm.slane %v891_v40, %v2376_v5  ;;  %v1905_v10 = vsel %vm1904_vm13, %v2393_v6, %v1903_v42  ;;  %v1063_v6 = vadd.f32 %v431_v52, %v430_v22  ;;  %v467_v42 = vld [vmem:[#allocation2 + $0xcb8] sm:$0xff]  ;;  %vm3026_vm13 = vcmask 654912  }
 0x1d8   :  { %v1711_v4 = vperm.slane %v888_v15, %v2361_v37  ;;  %v1117_v19 = vadd.f32 %v467_v42, %v466_v62  ;;  %vm3027_vm14 = vcmask 720512  }
 0x1da   :  { %v1712_v9 = vsel %vm3021_vm10, %v1711_v4, %v1710_v39  ;;  %1112 = vadd.xlane.f32.xlu2 %v1111_v47  ;;  %v413_v39 = vld [vmem:[#allocation2 + $0xb08] sm:$0xff]  ;;  %v486_v47 = vld [vmem:[#allocation2 + $0xd50] sm:$0xff]  ;;  %v487_v4 = vld [vmem:[#allocation2 + $0xd58] sm:$0xff] }
 0x1db   :  { %v1714_v59 = vsel %vm3023_vm7, %v1713_v38, %v1712_v9  ;;  %1031 = vadd.xlane.f32.xlu1 %v1030_v35  ;;  %v1036_v28 = vadd.f32 %v413_v39, %v412_v63  ;;  %v484_v35 = vld [vmem:[#allocation2 + $0xd40] sm:$0xff]  ;;  %v1147_v22 = vadd.f32 %v487_v4, %v486_v47  ;;  %vm3031_vm10 = vmmov %vm3027_vm14 }
 0x1dc   :  { %1109 = vadd.xlane.f32.xlu0 %v1108_v14  ;;  %v2658_v29 = vsel %vm1906_vm8, %v1714_v59, %v1905_v10  ;;  %v485_v14 = vld [vmem:[#allocation2 + $0xd48] sm:$0xff]  ;;  %vm3032_vm7 = vmmov %vm3028_vm15 }
 0x1dd   :  { %v903_v34 = vpop.xlane.xlu2 %902  ;;  %v1144_v52 = vadd.f32 %v485_v14, %v484_v35 }
 0x1de   :  { %v900_v7 = vpop.xlane.xlu1 %899  ;;  %v1720_v58 = vperm.slane %v903_v34, %v2288_v61 }
 0x1df   :  { %v897_v20 = vpop.xlane.xlu0 %896  ;;  %v1718_v46 = vperm.slane %v900_v7, %v2285_v17 }
 0x1e0   :  { %v1716_v11 = vperm.slane %v897_v20, %v2280_v2  ;;  %v468_v20 = vld [vmem:[#allocation2 + $0xcc0] sm:$0xff] }
 0x1e2   :  { %v1717_v49 = vsel %vm1441_vm0, %v1716_v11, %v1715_v33  ;;  %1064 = vadd.xlane.f32.xlu2 %v1063_v6  ;;  %v469_v6 = vld [vmem:[#allocation2 + $0xcc8] sm:$0xff]  ;;  %v415_v11 = vld [vmem:[#allocation2 + $0xb18] sm:$0xff] }
 0x1e3   :  { %v1719_v27 = vsel %vm1445_vm1, %v1718_v46, %v1717_v49  ;;  %1061 = vadd.xlane.f32.xlu1 %v1060_v56  ;;  %v434_v56 = vld [vmem:[#allocation2 + $0xbb0] sm:$0xff]  ;;  %v1120_v25 = vadd.f32 %v469_v6, %v468_v20 }
 0x1e4   :  { %1034 = vadd.xlane.f32.xlu0 %v1033_v26  ;;  %v1721_v45 = vsel %vm1449_vm2, %v1720_v58, %v1719_v27  ;;  %v435_v58 = vld [vmem:[#allocation2 + $0xbb8] sm:$0xff]  ;;  %v414_v46 = vld [vmem:[#allocation2 + $0xb10] sm:$0xff] }
 0x1e5   :  { %v912_v41 = vpop.xlane.xlu2 %911  ;;  %v1069_v63 = vadd.f32 %v435_v58, %v434_v56  ;;  %v1039_v39 = vadd.f32 %v415_v11, %v414_v46 }
 0x1e6   :  { %v909_v16 = vpop.xlane.xlu1 %908  ;;  %v1726_v48 = vperm.slane %v912_v41, %v2310_v55  ;;  %v416_v41 = vld [vmem:[#allocation2 + $0xb20] sm:$0xff] }
 0x1e7   :  { %v906_v3 = vpop.xlane.xlu0 %905  ;;  %v1724_v36 = vperm.slane %v909_v16, %v2299_v50  ;;  %v417_v16 = vld [vmem:[#allocation2 + $0xb28] sm:$0xff] }
 0x1e8   :  { %v1722_v21 = vperm.slane %v906_v3, %v2293_v1  ;;  %v382_v3 = vld [vmem:[#allocation2 + $0xa10] sm:$0xff]  ;;  %v1042_v47 = vadd.f32 %v417_v16, %v416_v41 }
 0x1ea   :  { %v1723_v40 = vsel %vm1453_vm3, %v1722_v21, %v1721_v45  ;;  %1067 = vadd.xlane.f32.xlu2 %v1066_v43  ;;  %v383_v43 = vld [vmem:[#allocation2 + $0xa18] sm:$0xff] }
 0x1eb   :  { %v1725_v15 = vsel %vm1457_vm4, %v1724_v36, %v1723_v40  ;;  %1037 = vadd.xlane.f32.xlu1 %v1036_v28  ;;  %v489_v36 = vld [vmem:[#allocation2 + $0xd68] sm:$0xff] }
 0x1ec   :  { %1115 = vadd.xlane.f32.xlu0 %v1114_v12  ;;  %v1727_v38 = vsel %vm1461_vm5, %v1726_v48, %v1725_v15  ;;  %v488_v48 = vld [vmem:[#allocation2 + $0xd60] sm:$0xff] }
 0x1ed   :  { %v921_v9 = vpop.xlane.xlu2 %920  ;;  %v1150_v62 = vadd.f32 %v489_v36, %v488_v48 }
 0x1ee   :  { %v918_v10 = vpop.xlane.xlu1 %917  ;;  %v1732_v24 = vperm.slane %v921_v9, %v2327_v51  ;;  %v490_v9 = vld [vmem:[#allocation2 + $0xd70] sm:$0xff] }
 0x1ef   :  { %v915_v59 = vpop.xlane.xlu0 %914  ;;  %v1730_v60 = vperm.slane %v918_v10, %v2304_v53 }
 0x1f0   :  { %v1728_v44 = vperm.slane %v915_v59, %v2307_v30  ;;  %v491_v59 = vld [vmem:[#allocation2 + $0xd78] sm:$0xff] }
 0x1f2   :  { %v1729_v33 = vsel %vm1465_vm6, %v1728_v44, %v1727_v38  ;;  %1148 = vadd.xlane.f32.xlu2 %v1147_v22  ;;  %v991_v38 = vadd.f32 %v383_v43, %v382_v3  ;;  %v470_v22 = vld [vmem:[#allocation2 + $0xcd0] sm:$0xff] }
 0x1f3   :  { %v1731_v34 = vsel %vm3025_vm11, %v1730_v60, %v1729_v33  ;;  %1145 = vadd.xlane.f32.xlu1 %v1144_v52  ;;  %v471_v52 = vld [vmem:[#allocation2 + $0xcd8] sm:$0xff]  ;;  %v437_v60 = vld [vmem:[#allocation2 + $0xbc8] sm:$0xff]  ;;  %vm3033_vm11 = vcmask 851712  }
 0x1f4   :  { %1118 = vadd.xlane.f32.xlu0 %v1117_v19  ;;  %v1733_v7 = vsel %vm3026_vm13, %v1732_v24, %v1731_v34  ;;  %v436_v24 = vld [vmem:[#allocation2 + $0xbc0] sm:$0xff]  ;;  %v1153_v34 = vadd.f32 %v491_v59, %v490_v9 }
 0x1f5   :  { %v930_v26 = vpop.xlane.xlu2 %929  ;;  %v1072_v58 = vadd.f32 %v437_v60, %v436_v24 }
 0x1f6   :  { %v927_v49 = vpop.xlane.xlu1 %926  ;;  %v1738_v21 = vperm.slane %v930_v26, %v2277_v54  ;;  %v438_v26 = vld [vmem:[#allocation2 + $0xbd0] sm:$0xff] }
 0x1f7   :  { %v924_v27 = vpop.xlane.xlu0 %923  ;;  %v1736_v45 = vperm.slane %v927_v49, %v2321_v18 }
 0x1f8   :  { %v1734_v13 = vperm.slane %v924_v27, %v2324_v23  ;;  %v439_v27 = vld [vmem:[#allocation2 + $0xbd8] sm:$0xff] }
 0x1f9   :  { %v1075_v41 = vadd.f32 %v439_v27, %v438_v26 }
 0x1fa   :  { %v1735_v31 = vsel %vm3027_vm14, %v1734_v13, %v1733_v7  ;;  %1121 = vadd.xlane.f32.xlu2 %v1120_v25  ;;  %v1123_v7 = vadd.f32 %v471_v52, %v470_v22  ;;  %v418_v25 = vld [vmem:[#allocation2 + $0xb30] sm:$0xff]  ;;  %v384_v13 = vld [vmem:[#allocation2 + $0xa20] sm:$0xff]  ;;  %vm3034_vm14 = vcmask 982912  }
 0x1fb   :  { %v1737_v8 = vsel %vm3028_vm15, %v1736_v45, %v1735_v31  ;;  %1070 = vadd.xlane.f32.xlu1 %v1069_v63  ;;  %v419_v45 = vld [vmem:[#allocation2 + $0xb38] sm:$0xff]  ;;  %v385_v63 = vld [vmem:[#allocation2 + $0xa28] sm:$0xff]  ;;  %vm3035_vm15 = vcmask 1048512  }
 0x1fc   :  { %1040 = vadd.xlane.f32.xlu0 %v1039_v39  ;;  %v2685_v28 = vsel %vm1906_vm8, %v1737_v8, %v2511_v57  ;;  %v1045_v16 = vadd.f32 %v419_v45, %v418_v25  ;;  %v994_v36 = vadd.f32 %v385_v63, %v384_v13  ;;  %vm3030_vm8 = vmmov %vm3026_vm13  ;;  %vm1908_vm13 = vcmask 1045509  }
 0x1fd   :  { %v939_v12 = vpop.xlane.xlu2 %938 }
 0x1fe   :  { %v936_v40 = vpop.xlane.xlu1 %935  ;;  %v1743_v4 = vperm.slane %v939_v12, %v2288_v61 }
 0x1ff   :  { %v933_v15 = vpop.xlane.xlu0 %932  ;;  %v1741_v35 = vperm.slane %v936_v40, %v2285_v17  ;;  %v386_v40 = vld [vmem:[#allocation2 + $0xa30] sm:$0xff] }
 0x200   :  { %v1739_v14 = vperm.slane %v933_v15, %v2280_v2 }
 0x202   :  { %v1740_v42 = vsel %vm1441_vm0, %v1739_v14, %v1738_v21  ;;  %1043 = vadd.xlane.f32.xlu2 %v1042_v47  ;;  %v387_v47 = vld [vmem:[#allocation2 + $0xa38] sm:$0xff]  ;;  %v473_v14 = vld [vmem:[#allocation2 + $0xce8] sm:$0xff] }
 0x203   :  { %v1742_v57 = vsel %vm1445_vm1, %v1741_v35, %v1740_v42  ;;  %992 = vadd.xlane.f32.xlu1 %v991_v38  ;;  %v492_v38 = vld [vmem:[#allocation2 + $0xd80] sm:$0xff]  ;;  %v997_v9 = vadd.f32 %v387_v47, %v386_v40 }
 0x204   :  { %1151 = vadd.xlane.f32.xlu0 %v1150_v62  ;;  %v1744_v10 = vsel %vm1449_vm2, %v1743_v4, %v1742_v57  ;;  %v493_v4 = vld [vmem:[#allocation2 + $0xd88] sm:$0xff]  ;;  %v472_v35 = vld [vmem:[#allocation2 + $0xce0] sm:$0xff] }
 0x205   :  { %v948_v44 = vpop.xlane.xlu2 %947  ;;  %v1126_v24 = vadd.f32 %v473_v14, %v472_v35 }
 0x206   :  { %v945_v19 = vpop.xlane.xlu1 %944  ;;  %v1749_v20 = vperm.slane %v948_v44, %v2310_v55 }
 0x207   :  { %v942_v33 = vpop.xlane.xlu0 %941  ;;  %v1747_v6 = vperm.slane %v945_v19, %v2299_v50  ;;  %v474_v19 = vld [vmem:[#allocation2 + $0xcf0] sm:$0xff] }
 0x208   :  { %v1745_v56 = vperm.slane %v942_v33, %v2293_v1 }
 0x20a   :  { %v1746_v46 = vsel %vm1453_vm3, %v1745_v56, %v1744_v10  ;;  %1154 = vadd.xlane.f32.xlu2 %v1153_v34  ;;  %v1156_v10 = vadd.f32 %v493_v4, %v492_v38  ;;  %v475_v34 = vld [vmem:[#allocation2 + $0xcf8] sm:$0xff]  ;;  %v421_v56 = vld [vmem:[#allocation2 + $0xb48] sm:$0xff] }
 0x20b   :  { %v1748_v11 = vsel %vm1457_vm4, %v1747_v6, %v1746_v46  ;;  %1124 = vadd.xlane.f32.xlu1 %v1123_v7  ;;  %v440_v7 = vld [vmem:[#allocation2 + $0xbe0] sm:$0xff]  ;;  %v1129_v26 = vadd.f32 %v475_v34, %v474_v19 }
 0x20c   :  { %1073 = vadd.xlane.f32.xlu0 %v1072_v58  ;;  %v1750_v49 = vsel %vm1461_vm5, %v1749_v20, %v1748_v11  ;;  %v441_v20 = vld [vmem:[#allocation2 + $0xbe8] sm:$0xff]  ;;  %v420_v6 = vld [vmem:[#allocation2 + $0xb40] sm:$0xff] }
 0x20d   :  { %v957_v39 = vpop.xlane.xlu2 %956  ;;  %v1048_v13 = vadd.f32 %v421_v56, %v420_v6  ;;  %v444_v56 = vld [vmem:[#allocation2 + $0xc00] sm:$0xff] }
 0x20e   :  { %v954_v31 = vpop.xlane.xlu1 %953  ;;  %v1755_v3 = vperm.slane %v957_v39, %v2327_v51 }
 0x20f   :  { %v951_v8 = vpop.xlane.xlu0 %950  ;;  %v1753_v43 = vperm.slane %v954_v31, %v2304_v53  ;;  %v422_v31 = vld [vmem:[#allocation2 + $0xb50] sm:$0xff] }
 0x210   :  { %v1751_v48 = vperm.slane %v951_v8, %v2307_v30  ;;  %v423_v8 = vld [vmem:[#allocation2 + $0xb58] sm:$0xff] }
 0x211   :  { %v1051_v47 = vadd.f32 %v423_v8, %v422_v31 }
 0x212   :  { %v1752_v21 = vsel %vm1465_vm6, %v1751_v48, %v1750_v49  ;;  %1076 = vadd.xlane.f32.xlu2 %v1075_v41  ;;  %v1078_v49 = vadd.f32 %v441_v20, %v440_v7  ;;  %v388_v41 = vld [vmem:[#allocation2 + $0xa40] sm:$0xff]  ;;  %v495_v48 = vld [vmem:[#allocation2 + $0xd98] sm:$0xff] }
 0x213   :  { %v1754_v12 = vsel %vm3029_vm9, %v1753_v43, %v1752_v21  ;;  %1046 = vadd.xlane.f32.xlu1 %v1045_v16  ;;  %v494_v43 = vld [vmem:[#allocation2 + $0xd90] sm:$0xff] }
 0x214   :  { %995 = vadd.xlane.f32.xlu0 %v994_v36  ;;  %v1756_v15 = vsel %vm3030_vm8, %v1755_v3, %v1754_v12  ;;  %v389_v3 = vld [vmem:[#allocation2 + $0xa48] sm:$0xff]  ;;  %v1159_v14 = vadd.f32 %v495_v48, %v494_v43  ;;  %v392_v43 = vld [vmem:[#allocation2 + $0xa60] sm:$0xff]  ;;  %vm3036_vm8 = vmmov %vm3029_vm9 }
 0x215   :  { %v966_v62 = vpop.xlane.xlu2 %965  ;;  %v1000_v35 = vadd.f32 %v389_v3, %v388_v41  ;;  %v393_v48 = vld [vmem:[#allocation2 + $0xa68] sm:$0xff] }
 0x216   :  { %v963_v42 = vpop.xlane.xlu1 %962  ;;  %v1761_v59 = vperm.slane %v966_v62, %v2367_v32 }
 0x217   :  { %v960_v57 = vpop.xlane.xlu0 %959  ;;  %v1759_v22 = vperm.slane %v963_v42, %v2321_v18 }
 0x218   :  { %v1757_v52 = vperm.slane %v960_v57, %v2324_v23  ;;  %v497_v57 = vld [vmem:[#allocation2 + $0xda8] sm:$0xff] }
 0x21a   :  { %v1758_v60 = vsel %vm3031_vm10, %v1757_v52, %v1756_v15  ;;  %998 = vadd.xlane.f32.xlu2 %v997_v9  ;;  %v476_v9 = vld [vmem:[#allocation2 + $0xd00] sm:$0xff]  ;;  %vm3037_vm10 = vcmask 654912  }
 0x21b   :  { %v1760_v44 = vsel %vm3032_vm7, %v1759_v22, %v1758_v60  ;;  %1157 = vadd.xlane.f32.xlu1 %v1156_v10  ;;  %v477_v10 = vld [vmem:[#allocation2 + $0xd08] sm:$0xff]  ;;  %v443_v22 = vld [vmem:[#allocation2 + $0xbf8] sm:$0xff]  ;;  %vm3039_vm7 = vmmov %vm3037_vm10 }
 0x21c   :  { %1127 = vadd.xlane.f32.xlu0 %v1126_v24  ;;  %v1762_v33 = vsel %vm3033_vm11, %v1761_v59, %v1760_v44  ;;  %v442_v59 = vld [vmem:[#allocation2 + $0xbf0] sm:$0xff]  ;;  %v1132_v34 = vadd.f32 %v477_v10, %v476_v9 }
 0x21d   :  { %v975_v58 = vpop.xlane.xlu2 %974  ;;  %v1081_v7 = vadd.f32 %v443_v22, %v442_v59 }
 0x21e   :  { %v972_v46 = vpop.xlane.xlu1 %971  ;;  %v1767_v27 = vperm.slane %v975_v58, %v2376_v5  ;;  %v445_v58 = vld [vmem:[#allocation2 + $0xc08] sm:$0xff] }
 0x21f   :  { %v969_v11 = vpop.xlane.xlu0 %968  ;;  %v1765_v25 = vperm.slane %v972_v46, %v2361_v37  ;;  %v424_v46 = vld [vmem:[#allocation2 + $0xb60] sm:$0xff] }
 0x220   :  { %v1763_v45 = vperm.slane %v969_v11, %v2364_v0  ;;  %v425_v11 = vld [vmem:[#allocation2 + $0xb68] sm:$0xff] }
 0x221   :  { %v1054_v8 = vadd.f32 %v425_v11, %v424_v46 }
 0x222   :  { %v1764_v63 = vsel %vm1489_vm12, %v1763_v45, %v1762_v33  ;;  %1130 = vadd.xlane.f32.xlu2 %v1129_v26  ;;  %v390_v26 = vld [vmem:[#allocation2 + $0xa50] sm:$0xff] }
 0x223   :  { %v1766_v39 = vsel %vm3034_vm14, %v1765_v25, %v1764_v63  ;;  %1079 = vadd.xlane.f32.xlu1 %v1078_v49  ;;  %v391_v49 = vld [vmem:[#allocation2 + $0xa58] sm:$0xff]  ;;  %v1084_v63 = vadd.f32 %v445_v58, %v444_v56 }
 0x224   :  { %1049 = vadd.xlane.f32.xlu0 %v1048_v13  ;;  %v1768_v16 = vsel %vm3035_vm15, %v1767_v27, %v1766_v39  ;;  %v1003_v41 = vadd.f32 %v391_v49, %v390_v26 }
 0x225   :  { %v2720_v36 = vsel %vm1908_vm13, %v1768_v16, %v2658_v29  ;;  %v984_v21 = vpop.xlane.xlu2 %983  ;;  %v496_v29 = vld [vmem:[#allocation2 + $0xda0] sm:$0xff] }
 0x226   :  { %v1772_v12 = vperm.slane %v984_v21, %v2285_v17  ;;  %v981_v40 = vpop.xlane.xlu1 %980  ;;  %v1162_v44 = vadd.f32 %v497_v57, %v496_v29  ;;  %v498_v21 = vld [vmem:[#allocation2 + $0xdb0] sm:$0xff] }
 0x227   :  { %v978_v15 = vpop.xlane.xlu0 %977  ;;  %v1770_v38 = vperm.slane %v981_v40, %v2280_v2  ;;  %v478_v40 = vld [vmem:[#allocation2 + $0xd10] sm:$0xff] }
 0x228   :  { %v1769_v4 = vperm.slane %v978_v15, %v2277_v54  ;;  %v479_v15 = vld [vmem:[#allocation2 + $0xd18] sm:$0xff] }
 0x229   :  { %v1135_v9 = vadd.f32 %v479_v15, %v478_v40 }
 0x22a   :  { %v1771_v62 = vsel %vm1441_vm0, %v1770_v38, %v1769_v4  ;;  %1052 = vadd.xlane.f32.xlu2 %v1051_v47 }
 0x22b   :  { %v1773_v42 = vsel %vm1445_vm1, %v1772_v12, %v1771_v62  ;;  %1001 = vadd.xlane.f32.xlu1 %v1000_v35  ;;  %v499_v12 = vld [vmem:[#allocation2 + $0xdb8] sm:$0xff]  ;;  %v1006_v62 = vadd.f32 %v393_v48, %v392_v43 }
 0x22c   :  { %1160 = vadd.xlane.f32.xlu0 %v1159_v14  ;;  %v1165_v57 = vadd.f32 %v499_v12, %v498_v21 }
 0x22d   :  { %v1014_v52 = vpop.xlane.xlu2 %1013 }
 0x22e   :  { %v990_v24 = vpop.xlane.xlu1 %989  ;;  %v1792_v27 = vperm.slane %v1014_v52, %v2277_v54  ;;  %v480_v52 = vld [vmem:[#allocation2 + $0xd20] sm:$0xff] }
 0x22f   :  { %v987_v60 = vpop.xlane.xlu0 %986  ;;  %v1776_v19 = vperm.slane %v990_v24, %v2293_v1  ;;  %v481_v24 = vld [vmem:[#allocation2 + $0xd28] sm:$0xff] }
 0x230   :  { %v1774_v33 = vperm.slane %v987_v60, %v2288_v61  ;;  %v446_v60 = vld [vmem:[#allocation2 + $0xc10] sm:$0xff]  ;;  %v1138_v58 = vadd.f32 %v481_v24, %v480_v52 }
 0x232   :  { %v1775_v20 = vsel %vm1449_vm2, %v1774_v33, %v1773_v42  ;;  %1163 = vadd.xlane.f32.xlu2 %v1162_v44  ;;  %v447_v44 = vld [vmem:[#allocation2 + $0xc18] sm:$0xff] }
 0x233   :  { %v2731_v6 = vsel %vm1453_vm3, %v1776_v19, %v1775_v20  ;;  %1133 = vadd.xlane.f32.xlu1 %v1132_v34  ;;  %v426_v19 = vld [vmem:[#allocation2 + $0xb70] sm:$0xff]  ;;  %v427_v33 = vld [vmem:[#allocation2 + $0xb78] sm:$0xff]  ;;  %v1087_v26 = vadd.f32 %v447_v44, %v446_v60 }
 0x234   :  { %1082 = vadd.xlane.f32.xlu0 %v1081_v7  ;;  %v1057_v49 = vadd.f32 %v427_v33, %v426_v19 }
 0x235   :  { %v1098_v25 = vpop.xlane.xlu2 %1097 }
 0x236   :  { %v1020_v45 = vpop.xlane.xlu1 %1019  ;;  %v1846_v47 = vperm.slane %v1098_v25, %v2277_v54 }
 0x237   :  { %v1017_v13 = vpop.xlane.xlu0 %1016  ;;  %v1795_v39 = vperm.slane %v1020_v45, %v2285_v17 }
 0x238   :  { %v1793_v31 = vperm.slane %v1017_v13, %v2280_v2  ;;  %v448_v13 = vld [vmem:[#allocation2 + $0xc20] sm:$0xff] }
 0x23a   :  { %v1794_v16 = vsel %vm1441_vm0, %v1793_v31, %v1792_v27  ;;  %1085 = vadd.xlane.f32.xlu2 %v1084_v63  ;;  %v449_v63 = vld [vmem:[#allocation2 + $0xc28] sm:$0xff]  ;;  %v395_v31 = vld [vmem:[#allocation2 + $0xa78] sm:$0xff] }
 0x23b   :  { %v1796_v3 = vsel %vm1445_vm1, %v1795_v39, %v1794_v16  ;;  %1055 = vadd.xlane.f32.xlu1 %v1054_v8  ;;  %v394_v39 = vld [vmem:[#allocation2 + $0xa70] sm:$0xff]  ;;  %v500_v8 = vld [vmem:[#allocation2 + $0xdc0] sm:$0xff]  ;;  %v1090_v21 = vadd.f32 %v449_v63, %v448_v13 }
 0x23c   :  { %1004 = vadd.xlane.f32.xlu0 %v1003_v41  ;;  %v501_v41 = vld [vmem:[#allocation2 + $0xdc8] sm:$0xff]  ;;  %v1009_v15 = vadd.f32 %v395_v31, %v394_v39 }
 0x23d   :  { %v1104_v38 = vpop.xlane.xlu2 %1103 }
 0x23e   :  { %v1849_v4 = vperm.slane %v1104_v38, %v2285_v17  ;;  %v1023_v35 = vpop.xlane.xlu1 %1022 }
 0x23f   :  { %v1101_v14 = vpop.xlane.xlu0 %1100  ;;  %v1797_v42 = vperm.slane %v1023_v35, %v2288_v61 }
 0x240   :  { %v1847_v29 = vperm.slane %v1101_v14, %v2280_v2  ;;  %v450_v14 = vld [vmem:[#allocation2 + $0xc30] sm:$0xff] }
 0x241   :  { %v1798_v10 = vsel %vm1449_vm2, %v1797_v42, %v1796_v3  ;;  %v502_v42 = vld [vmem:[#allocation2 + $0xdd0] sm:$0xff] }
 0x242   :  { %v1848_v59 = vsel %vm1441_vm0, %v1847_v29, %v1846_v47  ;;  %1007 = vadd.xlane.f32.xlu2 %v1006_v62  ;;  %v1168_v47 = vadd.f32 %v501_v41, %v500_v8  ;;  %v451_v62 = vld [vmem:[#allocation2 + $0xc38] sm:$0xff] }
 0x243   :  { %v1850_v22 = vsel %vm1445_vm1, %v1849_v4, %v1848_v59  ;;  %1166 = vadd.xlane.f32.xlu1 %v1165_v57  ;;  %v503_v29 = vld [vmem:[#allocation2 + $0xdd8] sm:$0xff]  ;;  %v482_v57 = vld [vmem:[#allocation2 + $0xd30] sm:$0xff]  ;;  %v1093_v24 = vadd.f32 %v451_v62, %v450_v14 }
 0x244   :  { %1136 = vadd.xlane.f32.xlu0 %v1135_v9  ;;  %v483_v9 = vld [vmem:[#allocation2 + $0xd38] sm:$0xff]  ;;  %v1171_v19 = vadd.f32 %v503_v29, %v502_v42 }
 0x245   :  { %v1029_v34 = vpop.xlane.xlu2 %1028  ;;  %v1141_v33 = vadd.f32 %v483_v9, %v482_v57 }
 0x246   :  { %v1801_v7 = vperm.slane %v1029_v34, %v2299_v50  ;;  %v1107_v20 = vpop.xlane.xlu1 %1106 }
 0x247   :  { %v1026_v56 = vpop.xlane.xlu0 %1025  ;;  %v1851_v46 = vperm.slane %v1107_v20, %v2288_v61  ;;  %v504_v20 = vld [vmem:[#allocation2 + $0xde0] sm:$0xff] }
 0x248   :  { %v1799_v11 = vperm.slane %v1026_v56, %v2293_v1  ;;  %v505_v56 = vld [vmem:[#allocation2 + $0xde8] sm:$0xff] }
 0x249   :  { %v1852_v27 = vsel %vm1449_vm2, %v1851_v46, %v1850_v22  ;;  %v507_v46 = vld [vmem:[#allocation2 + $0xdf8] sm:$0xff]  ;;  %v1174_v13 = vadd.f32 %v505_v56, %v504_v20 }
 0x24a   :  { %v1800_v25 = vsel %vm1453_vm3, %v1799_v11, %v1798_v10  ;;  %1139 = vadd.xlane.f32.xlu2 %v1138_v58  ;;  %v506_v58 = vld [vmem:[#allocation2 + $0xdf0] sm:$0xff] }
 0x24b   :  { %v1802_v45 = vsel %vm1457_vm4, %v1801_v7, %v1800_v25  ;;  %1088 = vadd.xlane.f32.xlu1 %v1087_v26  ;;  %v1177_v63 = vadd.f32 %v507_v46, %v506_v58 }
 0x24c   :  { %1058 = vadd.xlane.f32.xlu0 %v1057_v49 }
 0x24d   :  { %v1113_v16 = vpop.xlane.xlu2 %1112 }
 0x24e   :  { %v1855_v3 = vperm.slane %v1113_v16, %v2299_v50  ;;  %v1032_v43 = vpop.xlane.xlu1 %1031 }
 0x24f   :  { %v1110_v48 = vpop.xlane.xlu0 %1109  ;;  %v1803_v12 = vperm.slane %v1032_v43, %v2310_v55 }
 0x250   :  { %v1853_v40 = vperm.slane %v1110_v48, %v2293_v1 }
 0x251   :  { %v1804_v38 = vsel %vm1461_vm5, %v1803_v12, %v1802_v45 }
 0x252   :  { %v1854_v4 = vsel %vm1453_vm3, %v1853_v40, %v1852_v27  ;;  %1091 = vadd.xlane.f32.xlu2 %v1090_v21 }
 0x253   :  { %v1856_v35 = vsel %vm1457_vm4, %v1855_v3, %v1854_v4  ;;  %1010 = vadd.xlane.f32.xlu1 %v1009_v15 }
 0x254   :  { %1169 = vadd.xlane.f32.xlu0 %v1168_v47 }
 0x255   :  { %v1065_v10 = vpop.xlane.xlu2 %1064 }
 0x256   :  { %v1824_v59 = vperm.slane %v1065_v10, %v2280_v2  ;;  %v1062_v22 = vpop.xlane.xlu1 %1061 }
 0x257   :  { %v1035_v52 = vpop.xlane.xlu0 %1034  ;;  %v1823_v60 = vperm.slane %v1062_v22, %v2277_v54 }
 0x258   :  { %v1805_v44 = vperm.slane %v1035_v52, %v2307_v30 }
 0x259   :  { %v1825_v34 = vsel %vm1441_vm0, %v1824_v59, %v1823_v60 }
 0x25a   :  { %v1806_v7 = vsel %vm1465_vm6, %v1805_v44, %v1804_v38  ;;  %1094 = vadd.xlane.f32.xlu2 %v1093_v24 }
 0x25b   :  { %1172 = vadd.xlane.f32.xlu1 %v1171_v19 }
 0x25c   :  { %1142 = vadd.xlane.f32.xlu0 %v1141_v33 }
 0x25d   :  { %v1068_v11 = vpop.xlane.xlu2 %1067 }
 0x25e   :  { %v1826_v26 = vperm.slane %v1068_v11, %v2285_v17  ;;  %v1038_v49 = vpop.xlane.xlu1 %1037 }
 0x25f   :  { %v1116_v27 = vpop.xlane.xlu0 %1115  ;;  %v1807_v25 = vperm.slane %v1038_v49, %v2304_v53 }
 0x260   :  { %v1857_v45 = vperm.slane %v1116_v27, %v2310_v55  ;;  %v1827_v39 = vsel %vm1445_vm1, %v1826_v26, %v1825_v34 }
 0x261   :  { %v1808_v31 = vsel %vm3029_vm9, %v1807_v25, %v1806_v7  ;;  %vm3045_vm9 = vmmov %vm3039_vm7 }
 0x262   :  { %v1858_v8 = vsel %vm1461_vm5, %v1857_v45, %v1856_v35 }
 0x263   :  { %1178 = vadd.xlane.f32.xlu1 %v1177_v63 }
 0x264   :  { %1175 = vadd.xlane.f32.xlu0 %v1174_v13 }
 0x265   :  { %v1149_v41 = vpop.xlane.xlu2 %1148 }
 0x266   :  { %v1878_v16 = vperm.slane %v1149_v41, %v2280_v2  ;;  %v1146_v3 = vpop.xlane.xlu1 %1145  ;;  %v1194_v41 = vld [vmem:[#allocation5 + $0x70] sm:$0xff] }
 0x267   :  { %v1119_v43 = vpop.xlane.xlu0 %1118  ;;  %v1877_v48 = vperm.slane %v1146_v3, %v2277_v54 }
 0x268   :  { %v1859_v21 = vperm.slane %v1119_v43, %v2307_v30 }
 0x269   :  { %v1879_v12 = vsel %vm1441_vm0, %v1878_v16, %v1877_v48  ;;  %vm3038_vm0 = vcmask 720512   ;;  %v1193_v48 = vld [vmem:[#allocation5 + $0x68] sm:$0xff] }
 0x26a   :  { %v1860_v40 = vsel %vm1465_vm6, %v1859_v21, %v1858_v8  ;;  %v1195_v8 = vld [vmem:[#allocation5 + $0x78] sm:$0xff]  ;;  %v1192_v21 = vld [vmem:[#allocation5 + $0x60] sm:$0xff] }
 0x26b   :  { %1925 = vmatpush.msra.mxu0 %v1195_v8 }
 0x26d   :  { %v1122_v15 = vpop.xlane.xlu2 %1121  ;;  %1926 = vmatpush.msra.mxu0 %v1194_v41 }
 0x26e   :  { %v1861_v47 = vperm.slane %v1122_v15, %v2304_v53  ;;  %v1071_v38 = vpop.xlane.xlu1 %1070 }
 0x26f   :  { %v1041_v4 = vpop.xlane.xlu0 %1040  ;;  %v1828_v35 = vperm.slane %v1071_v38, %v2288_v61  ;;  %1927 = vmatpush.msra.mxu0 %v1193_v48  ;;  %v1189_v38 = vld [vmem:[#allocation5 + $0x48] sm:$0xff] }
 0x270   :  { %v1809_v14 = vperm.slane %v1041_v4, %v2327_v51  ;;  %v1862_v2 = vsel %vm3036_vm8, %v1861_v47, %v1860_v40  ;;  %v1190_v40 = vld [vmem:[#allocation5 + $0x50] sm:$0xff]  ;;  %v1188_v4 = vld [vmem:[#allocation5 + $0x40] sm:$0xff] }
 0x271   :  { %v1829_v62 = vsel %vm1449_vm2, %v1828_v35, %v1827_v39  ;;  %1928 = vmatpush.msra.mxu0 %v1192_v21  ;;  %v1187_v35 = vld [vmem:[#allocation5 + $0x38] sm:$0xff] }
 0x272   :  { %v1810_v54 = vsel %vm3037_vm10, %v1809_v14, %v1808_v31  ;;  %v1207_v14 = vld [vmem:[#allocation5 + $0xd8] sm:$0xff] }
 0x273   :  { %1949 = vmatpush.msra.mxu1 %v1207_v14 }
 0x275   :  { %v1044_v42 = vpop.xlane.xlu2 %1043 }
 0x276   :  { %v1811_v29 = vperm.slane %v1044_v42, %v2324_v23  ;;  %v993_v57 = vpop.xlane.xlu1 %992 }
 0x277   :  { %v1152_v9 = vpop.xlane.xlu0 %1151  ;;  %v1778_v10 = vperm.slane %v993_v57, %v2299_v50  ;;  %v1185_v57 = vld [vmem:[#allocation5 + $0x28] sm:$0xff] }
 0x278   :  { %v1880_v59 = vperm.slane %v1152_v9, %v2285_v17  ;;  %v1812_v22 = vsel %vm3038_vm0, %v1811_v29, %v1810_v54  ;;  %v1206_v29 = vld [vmem:[#allocation5 + $0xd0] sm:$0xff]  ;;  %v1205_v9 = vld [vmem:[#allocation5 + $0xc8] sm:$0xff] }
 0x279   :  { %v1779_v52 = vsel %vm1457_vm4, %v1778_v10, %v2731_v6  ;;  %1950 = vmatpush.msra.mxu1 %v1206_v29  ;;  %v1184_v10 = vld [vmem:[#allocation5 + $0x20] sm:$0xff] }
 0x27a   :  { %v1881_v24 = vsel %vm1445_vm1, %v1880_v59, %v1879_v12  ;;  %vm3040_vm1 = vcmask 786112   ;;  %v1191_v12 = vld [vmem:[#allocation5 + $0x58] sm:$0xff]  ;;  %v1204_v59 = vld [vmem:[#allocation5 + $0xc0] sm:$0xff] }
 0x27b   :  { %1929 = vmatpush.msra.mxu0 %v1191_v12  ;;  %1951 = vmatpush.msra.mxu1 %v1205_v9  ;;  %vm3047_vm10 = vmmov %vm3040_vm1 }
 0x27d   :  { %v1155_v60 = vpop.xlane.xlu2 %1154  ;;  %1930 = vmatpush.msra.mxu0 %v1190_v40  ;;  %1952 = vmatpush.msra.mxu1 %v1204_v59 }
 0x27e   :  { %v1882_v44 = vperm.slane %v1155_v60, %v2288_v61  ;;  %v1125_v19 = vpop.xlane.xlu1 %1124 }
 0x27f   :  { %v1074_v33 = vpop.xlane.xlu0 %1073  ;;  %v1863_v34 = vperm.slane %v1125_v19, %v2327_v51  ;;  %1931 = vmatpush.msra.mxu0 %v1189_v38 }
 0x280   :  { %v1830_v7 = vperm.slane %v1074_v33, %v2293_v1  ;;  %v1883_v20 = vsel %vm1449_vm2, %v1882_v44, %v1881_v24  ;;  %v1182_v24 = vld [vmem:[#allocation5 + $0x10] sm:$0xff]  ;;  %vm3041_vm2 = vmmov %vm3033_vm11 }
 0x281   :  { %v2791_v17 = vsel %vm3039_vm7, %v1863_v34, %v1862_v2  ;;  %1932 = vmatpush.msra.mxu0 %v1188_v4  ;;  %v1186_v2 = vld [vmem:[#allocation5 + $0x30] sm:$0xff]  ;;  %v1181_v34 = vld [vmem:[#allocation5 + $0x8] sm:$0xff]  ;;  %vm3042_vm11 = vmmov %vm3034_vm14 }
 0x282   :  { %v1831_v56 = vsel %vm1453_vm3, %v1830_v7, %v1829_v62  ;;  %v1202_v33 = vld [vmem:[#allocation5 + $0xb0] sm:$0xff]  ;;  %v1201_v7 = vld [vmem:[#allocation5 + $0xa8] sm:$0xff]  ;;  %vm3043_vm14 = vmmov %vm3035_vm15 }
 0x283   :  { %1933 = vmatpush.msra.mxu0 %v1187_v35  ;;  %vm3044_vm15 = vmmov %vm3036_vm8 }
 0x284   :  { %vm3046_vm8 = vmmov %vm3038_vm0 }
 0x285   :  { %v1077_v58 = vpop.xlane.xlu2 %1076  ;;  %1934 = vmatpush.msra.mxu0 %v1186_v2  ;;  %vm3048_vm7 = vmmov %vm3040_vm1 }
 0x286   :  { %v1832_v6 = vperm.slane %v1077_v58, %v2299_v50  ;;  %v1047_v46 = vpop.xlane.xlu1 %1046  ;;  %v1199_v58 = vld [vmem:[#allocation5 + $0x98] sm:$0xff] }
 0x287   :  { %v996_v11 = vpop.xlane.xlu0 %995  ;;  %v1813_v61 = vperm.slane %v1047_v46, %v2321_v18  ;;  %1935 = vmatpush.msra.mxu0 %v1185_v57 }
 0x288   :  { %v1780_v26 = vperm.slane %v996_v11, %v2310_v55  ;;  %v2798_v49 = vsel %vm1457_vm4, %v1832_v6, %v1831_v56  ;;  %v1200_v56 = vld [vmem:[#allocation5 + $0xa0] sm:$0xff] }
 0x289   :  { %v2801_v27 = vsel %vm3040_vm1, %v1813_v61, %v1812_v22  ;;  %v1183_v22 = vld [vmem:[#allocation5 + $0x18] sm:$0xff]  ;;  %1936 = vmatpush.msra.mxu0 %v1184_v10  ;;  %v1198_v61 = vld [vmem:[#allocation5 + $0x90] sm:$0xff]  ;;  %vm3049_vm1 = vmmov %vm3044_vm15 }
 0x28a   :  { %v2804_v25 = vsel %vm1461_vm5, %v1780_v26, %v1779_v52  ;;  %v1203_v52 = vld [vmem:[#allocation5 + $0xb8] sm:$0xff]  ;;  %v1197_v26 = vld [vmem:[#allocation5 + $0x88] sm:$0xff] }
 0x28b   :  { %1937 = vmatpush.msra.mxu0 %v1183_v22  ;;  %1953 = vmatpush.msra.mxu1 %v1203_v52 }
 0x28d   :  { %v2806_v45 = vpop.xlane.xlu2 %998  ;;  %1938 = vmatpush.msra.mxu0 %v1182_v24  ;;  %1954 = vmatpush.msra.mxu1 %v1202_v33 }
 0x28e   :  { %v1158_v13 = vpop.xlane.xlu1 %1157 }
 0x28f   :  { %v2808_v63 = vpop.xlane.xlu0 %1127  ;;  %v1884_v39 = vperm.slane %v1158_v13, %v2293_v1  ;;  %1939 = vmatpush.msra.mxu0 %v1181_v34  ;;  %1955 = vmatpush.msra.mxu1 %v1201_v7  ;;  %v1196_v13 = vld [vmem:[#allocation5 + $0x80] sm:$0xff] }
 0x291   :  { %v2812_v31 = vsel %vm1453_vm3, %v1884_v39, %v1883_v20  ;;  %v1180_v20 = vld [vmem:[#allocation5] sm:$0xff]  ;;  %1956 = vmatpush.msra.mxu1 %v1200_v56  ;;  %vm1910_vm3 = vcmask 1046534  }
 0x292   :  { %1940 = vmatpush.msra.mxu0 %v1180_v20 }
 0x293   :  { %1957 = vmatpush.msra.mxu1 %v1199_v58 }
 0x295   :  { %v2814_v16 = vpop.xlane.xlu2 %1130  ;;  %1958 = vmatpush.msra.mxu1 %v1198_v61 }
 0x296   :  { %v2816_v3 = vpop.xlane.xlu1 %1079 }
 0x297   :  { %v2818_v43 = vpop.xlane.xlu0 %1049  ;;  %1959 = vmatpush.msra.mxu1 %v1197_v26  ;;  %v1834_v22 = vperm.slane %v2816_v3, %v2310_v55 }
 0x298   :  { %v1815_v39 = vperm.slane %v2818_v43, %v2367_v32  ;;  %v1782_v43 = vperm.slane %v2806_v45, %v2307_v30 }
 0x299   :  { %1960 = vmatpush.msra.mxu1 %v1196_v13 }
 0x29a   :  { %v1816_v21 = vsel %vm3041_vm2, %v1815_v39, %v2801_v27  ;;  %v1783_v57 = vsel %vm1465_vm6, %v1782_v43, %v2804_v25  ;;  %v1993_v43 = vld [vmem:[#allocation7] ss:$0 sm:$0xff] }
 0x29d   :  { %v2820_v1 = vpop.xlane.xlu2 %1052 }
 0x29e   :  { %v2822_v15 = vpop.xlane.xlu1 %1001  ;;  %v1817_v8 = vperm.slane %v2820_v1, %v2364_v0 }
 0x29f   :  { %v2824_v47 = vpop.xlane.xlu0 %1160  ;;  %v1784_v14 = vperm.slane %v2822_v15, %v2304_v53 }
 0x2a0   :  { %v1818_v38 = vsel %vm1489_vm12, %v1817_v8, %v1816_v21 }
 0x2a1   :  { %v1785_v10 = vsel %vm3044_vm15, %v1784_v14, %v1783_v57  ;;  %vm3053_vm15 = vmmov %vm3048_vm7 }
 0x2a5   :  { %v2826_v62 = vpop.xlane.xlu2 %1163 }
 0x2a6   :  { %v2828_v54 = vpop.xlane.xlu1 %1133  ;;  %v1888_v8 = vperm.slane %v2826_v62, %v2310_v55 }
 0x2a7   :  { %v2830_v42 = vpop.xlane.xlu0 %1082  ;;  %v1869_v33 = vperm.slane %v2828_v54, %v2367_v32 }
 0x2a8   :  { %v1836_v24 = vperm.slane %v2830_v42, %v2307_v30  ;;  %v1835_v42 = vsel %vm1461_vm5, %v1834_v22, %v2798_v49 }
 0x2aa   :  { %v1837_v20 = vsel %vm1465_vm6, %v1836_v24, %v1835_v42 }
 0x2ad   :  { %v2832_v60 = vpop.xlane.xlu2 %1085 }
 0x2ae   :  { %v1056_v44 = vpop.xlane.xlu1 %1055 }
 0x2af   :  { %v1005_v19 = vpop.xlane.xlu0 %1004  ;;  %v1819_v41 = vperm.slane %v1056_v44, %v2361_v37  ;;  %v1867_v44 = vperm.slane %v2814_v16, %v2321_v18 }
 0x2b0   :  { %v1786_v2 = vperm.slane %v1005_v19, %v2327_v51  ;;  %v1838_v19 = vperm.slane %v2832_v60, %v2304_v53 }
 0x2b1   :  { %v1820_v35 = vsel %vm3042_vm11, %v1819_v41, %v1818_v38  ;;  %vm3052_vm11 = vmmov %vm3038_vm0 }
 0x2b2   :  { %v1787_v15 = vsel %vm3045_vm9, %v1786_v2, %v1785_v10  ;;  %v1839_v54 = vsel %vm3049_vm1, %v1838_v19, %v1837_v20 }
 0x2b5   :  { %v1008_v6 = vpop.xlane.xlu2 %1007 }
 0x2b6   :  { %v2834_v46 = vpop.xlane.xlu1 %1166  ;;  %v1788_v29 = vperm.slane %v1008_v6, %v2324_v23 }
 0x2b7   :  { %v1137_v11 = vpop.xlane.xlu0 %1136  ;;  %v1890_v21 = vperm.slane %v2834_v46, %v2307_v30 }
 0x2b8   :  { %v1789_v25 = vsel %vm3046_vm8, %v1788_v29, %v1787_v15  ;;  %v1871_v7 = vperm.slane %v1137_v11, %v2364_v0  ;;  %vm3055_vm8 = vcmask 1048512  }
 0x2bd   :  { %v1140_v48 = vpop.xlane.xlu2 %1139 }
 0x2be   :  { %v1089_v12 = vpop.xlane.xlu1 %1088  ;;  %v1873_v56 = vperm.slane %v1140_v48, %v2361_v37  ;;  %v1886_v37 = vperm.slane %v2824_v47, %v2299_v50 }
 0x2bf   :  { %v1059_v40 = vpop.xlane.xlu0 %1058  ;;  %v1840_v34 = vperm.slane %v1089_v12, %v2327_v51 }
 0x2c0   :  { %v1821_v4 = vperm.slane %v1059_v40, %v2376_v5  ;;  %v1887_v50 = vsel %vm1457_vm4, %v1886_v37, %v2812_v31  ;;  %vm3059_vm4 = vmmov %vm3048_vm7 }
 0x2c1   :  { %v1889_v40 = vsel %vm1461_vm5, %v1888_v8, %v1887_v50 }
 0x2c2   :  { %v1822_v1 = vsel %vm3043_vm14, %v1821_v4, %v1820_v35  ;;  %vm1912_vm14 = vcmask 1047559   ;;  %v1891_v55 = vsel %vm1465_vm6, %v1890_v21, %v1889_v40 }
 0x2c3   :  { %v1911_v27 = vsel %vm1910_vm3, %v1822_v1, %v2720_v36  ;;  %v1865_v36 = vperm.slane %v2808_v63, %v2324_v23 }
 0x2c5   :  { %v1092_v9 = vpop.xlane.xlu2 %1091  ;;  %v1866_v60 = vsel %vm3038_vm0, %v1865_v36, %v2791_v17 }
 0x2c6   :  { %v1011_v59 = vpop.xlane.xlu1 %1010  ;;  %v1842_v16 = vperm.slane %v1092_v9, %v2324_v23  ;;  %v1868_v32 = vsel %vm3048_vm7, %v1867_v44, %v1866_v60 }
 0x2c7   :  { %v1170_v45 = vpop.xlane.xlu0 %1169  ;;  %v1790_v52 = vperm.slane %v1011_v59, %v2321_v18 }
 0x2c8   :  { %v1892_v12 = vperm.slane %v1170_v45, %v2304_v53 }
 0x2c9   :  { %v1791_v3 = vsel %vm3047_vm10, %v1790_v52, %v1789_v25  ;;  %vm3058_vm10 = vmmov %vm3038_vm0  ;;  %vm1922_vm0 = vcmask 785408  }
 0x2ca   :  { %v1918_v63 = vsel %vm1908_vm13, %v1791_v3, %v2685_v28  ;;  %vm3050_vm13 = vmmov %vm3041_vm2 }
 0x2cb   :  { %v1870_v28 = vsel %vm3050_vm13, %v1869_v33, %v1868_v32  ;;  %vm3051_vm2 = vmmov %vm3045_vm9  ;;  %vm3054_vm9 = vcmask 982912  }
 0x2cc   :  { %v1841_v49 = vsel %vm3051_vm2, %v1840_v34, %v1839_v54  ;;  %v1872_v61 = vsel %vm1489_vm12, %v1871_v7, %v1870_v28  ;;  %vm3056_vm12 = vmmov %vm3049_vm1 }
 0x2cd   :  { %v1095_v58 = vpop.xlane.xlu2 %1094  ;;  %v1843_v17 = vsel %vm3052_vm11, %v1842_v16, %v1841_v49  ;;  %v1874_v39 = vsel %vm3054_vm9, %v1873_v56, %v1872_v61  ;;  %v1893_v4 = vsel %vm3056_vm12, %v1892_v12, %v1891_v55 }
 0x2ce   :  { %v1844_v0 = vperm.slane %v1095_v58, %v2321_v18  ;;  %v1173_v6 = vpop.xlane.xlu1 %1172 }
 0x2cf   :  { %v1143_v11 = vpop.xlane.xlu0 %1142  ;;  %v1894_v47 = vperm.slane %v1173_v6, %v2327_v51 }
 0x2d0   :  { %v1875_v26 = vperm.slane %v1143_v11, %v2376_v5  ;;  %v1845_v13 = vsel %vm3053_vm15, %v1844_v0, %v1843_v17 }
 0x2d1   :  { %v1919_v48 = vsel %vm1910_vm3, %v1845_v13, %v1918_v63  ;;  %vm3057_vm3 = vmmov %vm3051_vm2 }
 0x2d2   :  { %v1876_v41 = vsel %vm3055_vm8, %v1875_v26, %v1874_v39  ;;  %v1895_v53 = vsel %vm3057_vm3, %v1894_v47, %v1893_v4 }
 0x2d3   :  { %v1913_v5 = vsel %vm1912_vm14, %v1876_v41, %v1911_v27 }
 0x2d4   :  { %1941 = vmatmul.f32.vlgmr.msra.gmra.mxu0 %v1913_v5 }
 0x2d6   :  { %v1179_v38 = vpop.xlane.xlu1 %1178 }
 0x2d7   :  { %v1176_v62 = vpop.xlane.xlu0 %1175  ;;  %v1898_v46 = vperm.slane %v1179_v38, %v2321_v18 }
 0x2d8   :  { %v1896_v30 = vperm.slane %v1176_v62, %v2324_v23 }
 0x2da   :  { %v1897_v35 = vsel %vm3058_vm10, %v1896_v30, %v1895_v53 }
 0x2db   :  { %v1899_v31 = vsel %vm3059_vm4, %v1898_v46, %v1897_v35 }
 0x2dc   :  { %v1920_v51 = vsel %vm1912_vm14, %v1899_v31, %v1919_v48 }
 0x2dd   :  { %1984 = vmatmul.msk.f32.vlgmr.msra.gmra.mxu1 %vm1922_vm0, %v1920_v51 }
 0x351   :  { %v1942_v1 = vpop.f32.mrf.mxu0 }
 0x352   :  { %v1943_v23 = vadd.f32 %v1993_v43, %v1942_v1 }
 0x35a   :  { %v1962_v18 = vpop.f32.mrf.mxu1 }
 0x35b   :  { %v1963_v14 = vadd.f32 %v1962_v18, %v1943_v23 }
 0x35d   :  { %1965 = vst [vmem:[#allocation8] sm:$0xff] %v1963_v14 }
 0x35e   :  { %1976 = dma.vmem_to_hbm [thread:$0]  %s1972_s2, 128, %s1974_s5, [#allocation4]  }
 0x35f   :  { %2094 = dma.done.wait [#allocation4], 128  }
 0x360   :  { %2095 = vsyncadd [#allocation4], 4294967168 }
 0x361   :  { %1981 = vsyncpa [#allocation3], 1 }
 0x362   :  { %1982 = vsyncpa [#allocation6], 1 }
 0x363   :  { %1983 = vsyncpa [#allocation4], 1 }

</bundles_post_ra>
